<compile_context>
chip_gen: v5e
topology: v5e:2x2
jax: 0.10.0
libtpu: 0.0.40
codegen_flags: <defaults>
</compile_context>

<pallas_src>
import functools

import jax
import jax.numpy as jnp
from jax.experimental import pallas as pl
from jax.experimental.pallas import tpu as pltpu


# ---------------------------------------------------------------------------
# Pallas kernels
# ---------------------------------------------------------------------------

def _input_proj_kernel(x_ref, w_ref, b_ref, o_ref):
    """One row-tile per grid step (parallel): o = x @ w + b, bf16 MXU / f32 acc."""
    acc = jnp.dot(x_ref[...].astype(jnp.bfloat16), w_ref[...],
                  preferred_element_type=jnp.float32)
    o_ref[...] = (acc + b_ref[...]).astype(o_ref.dtype)      # GI stored as bf16


def _gru_head_kernel(gi_ref, h0_ref, whh_ref, bhn_ref, wout_ref, bout_ref,
                     rnn_ref, out_ref, h_scr):
    """One grid step == t_chunk timesteps of the GRU recurrence for one batch
    slice, with the ReLU output head fused in (fills MXU idle cycles while the
    h_t -> h_{t+1} dependency stalls the recurrence)."""
    c = pl.program_id(1)

    @pl.when(c == 0)
    def _():
        h_scr[...] = h0_ref[...].astype(jnp.float32)

    H = h_scr.shape[-1]
    t_chunk = gi_ref.shape[1]
    whh = whh_ref[...]            # (H, 3H) bf16, resident for the whole chunk
    bhn = bhn_ref[...]            # (1, H)  f32
    wout = wout_ref[...]          # (H, O)  bf16
    bout = bout_ref[...]          # (1, O)  f32

    h = h_scr[...]                # (Bs, H) f32 recurrent state
    # Fully unrolled (static indices) so the LLO scheduler can overlap
    # MXU / EUP / VPU work across timesteps.
    for tc in range(t_chunk):
        gi = gi_ref[:, tc, :].astype(jnp.float32)                     # (Bs, 3H)
        gh = jnp.dot(h.astype(jnp.bfloat16), whh,
                     preferred_element_type=jnp.float32)              # (Bs, 3H)
        r = jax.nn.sigmoid(gi[:, :H] + gh[:, :H])
        z = jax.nn.sigmoid(gi[:, H:2 * H] + gh[:, H:2 * H])
        n = jnp.tanh(gi[:, 2 * H:] + r * (gh[:, 2 * H:] + bhn))
        h = n + z * (h - n)                                           # (1-z)n + zh
        rnn_ref[:, tc, :] = h.astype(rnn_ref.dtype)
        y = jnp.dot(h.astype(jnp.bfloat16), wout,
                    preferred_element_type=jnp.float32) + bout
        out_ref[:, tc, :] = jnp.maximum(y, 0.0).astype(out_ref.dtype)
    h_scr[...] = h


# ---------------------------------------------------------------------------
# Wrapper
# ---------------------------------------------------------------------------

def _vmem_limit(block_bytes):
    """Explicit scoped-VMEM budget from the actual double-buffered block bytes."""
    return int(max(int(block_bytes * 1.5) + (4 << 20), 32 << 20))


def _rowwise_matmul(kernel, x2d, w, b, out_cols, out_dtype):
    """Parallel row-tiled matmul pass.  Tile capped at 512 rows (v5e-safe),
    ragged row counts padded so the tile never collapses to a tiny size."""
    rows, in_cols = x2d.shape
    tile = rows if rows <= 512 else 512
    rows_p = -(-rows // tile) * tile
    xp = x2d if rows_p == rows else jnp.pad(x2d, ((0, rows_p - rows), (0, 0)))

    out_isize = jnp.dtype(out_dtype).itemsize
    blk = (2 * tile * in_cols * 4                      # x blocks (double buffered)
           + 2 * tile * out_cols * out_isize           # out blocks
           + 2 * int(w.size) * w.dtype.itemsize        # weight
           + 2 * int(b.size) * 4)                      # bias

    out = pl.pallas_call(
        kernel,
        out_shape=jax.ShapeDtypeStruct((rows_p, out_cols), out_dtype),
        grid_spec=pltpu.PrefetchScalarGridSpec(
            num_scalar_prefetch=0,
            grid=(rows_p // tile,),
            in_specs=[
                pl.BlockSpec((tile, in_cols), lambda i: (i, 0)),
                pl.BlockSpec(w.shape, lambda i: (0, 0)),
                pl.BlockSpec(b.shape, lambda i: (0, 0)),
            ],
            out_specs=pl.BlockSpec((tile, out_cols), lambda i: (i, 0)),
        ),
        compiler_params=pltpu.CompilerParams(
            dimension_semantics=("parallel",),
            vmem_limit_bytes=_vmem_limit(blk)),
    )(xp, w, b)
    return out if rows_p == rows else out[:rows]


def goal_rnn_forward(x, hn, seq_lens, params, *, t_chunk=16):
    """x: (B, S, I) batch-first, hn: (1, B, H).  Returns (relu_out, rnn_out),
    both batch-first (B, S, *), matching the PyTorch module."""
    del seq_lens  # unused by the reference forward (no pack_padded_sequence)
    B, S, I = x.shape
    H = params["w_hh"].shape[-1]
    O = params["w_out"].shape[-1]

    # ---- fuse parameters (gate order r, z, n); weights to bf16 ----------------
    w_ih_f = jnp.concatenate(
        [params["w_ih"][g] for g in range(3)], axis=1).astype(jnp.bfloat16)   # (I, 3H)
    w_hh_f = jnp.concatenate(
        [params["w_hh"][g] for g in range(3)], axis=1).astype(jnp.bfloat16)   # (H, 3H)
    # r/z biases fold completely; for n only b_ih folds (b_hh_n sits inside r*(...)).
    b_gi = jnp.concatenate(
        [params["b_ih"][0] + params["b_hh"][0],
         params["b_ih"][1] + params["b_hh"][1],
         params["b_ih"][2]], axis=0)[None, :]                                 # (1, 3H) f32
    b_hn = params["b_hh"][2][None, :]                                         # (1, H)  f32
    w_out = params["w_out"].astype(jnp.bfloat16)                              # (H, O)
    b_out = params["b_out"][None, :]                                          # (1, O)  f32

    # ---- batch-first; pad S to a multiple of t_chunk (no transposes) ----------
    t_chunk = max(1, min(t_chunk, S))
    n_chunks = -(-S // t_chunk)
    s_pad = n_chunks * t_chunk
    x_p = x if s_pad == S else jnp.pad(x, ((0, 0), (0, s_pad - S), (0, 0)))

    # ---- pass 1 (parallel): hoisted input projection, GI in bf16 ---------------
    gi = _rowwise_matmul(_input_proj_kernel, x_p.reshape(B * s_pad, I),
                         w_ih_f, b_gi, 3 * H, jnp.bfloat16)
    gi = gi.reshape(B, s_pad, 3 * H)

    # ---- pass 2 (batch-parallel x sequential): recurrence + fused ReLU head ----
    # Split the batch across the parallel grid axis (2 TCs on v7x) when the
    # half-batch still fills the 8-sublane tile.
    n_bsplit = 2 if (B % 16 == 0) else 1
    Bs = B // n_bsplit

    blk = (2 * Bs * t_chunk * 3 * H * 2        # GI blocks (bf16)
           + 2 * Bs * t_chunk * H * 4          # rnn_out blocks
           + 2 * Bs * t_chunk * O * 4          # relu out blocks
           + 2 * Bs * H * 4                    # h0
           + 2 * H * 3 * H * 2                 # W_hh (bf16)
           + 2 * H * O * 2                     # W_out (bf16)
           + Bs * H * 4 + 8 * (H + O) * 4)     # scratch + small biases

    rnn_out, out = pl.pallas_call(
        _gru_head_kernel,
        out_shape=(jax.ShapeDtypeStruct((B, s_pad, H), jnp.float32),
                   jax.ShapeDtypeStruct((B, s_pad, O), jnp.float32)),
        grid_spec=pltpu.PrefetchScalarGridSpec(
            num_scalar_prefetch=0,
            grid=(n_bsplit, n_chunks),
            in_specs=[
                # On v5e, try pipeline_mode=pl.Buffered(3) here if GI DMA is exposed.
                pl.BlockSpec((Bs, t_chunk, 3 * H), lambda b, c: (b, c, 0)),  # GI
                pl.BlockSpec((Bs, H), lambda b, c: (b, 0)),                  # h0
                pl.BlockSpec((H, 3 * H), lambda b, c: (0, 0)),               # W_hh fused
                pl.BlockSpec((1, H), lambda b, c: (0, 0)),                   # b_hh (n)
                pl.BlockSpec((H, O), lambda b, c: (0, 0)),                   # W_out
                pl.BlockSpec((1, O), lambda b, c: (0, 0)),                   # b_out
            ],
            out_specs=[
                pl.BlockSpec((Bs, t_chunk, H), lambda b, c: (b, c, 0)),      # rnn_out
                pl.BlockSpec((Bs, t_chunk, O), lambda b, c: (b, c, 0)),      # relu out
            ],
            scratch_shapes=[pltpu.VMEM((Bs, H), jnp.float32)],               # recurrent h
        ),
        compiler_params=pltpu.CompilerParams(
            dimension_semantics=("parallel", "arbitrary"),
            vmem_limit_bytes=_vmem_limit(blk)),
    )(gi, hn[0], w_hh_f, b_hn, w_out, b_out)

    if s_pad != S:
        rnn_out = rnn_out[:, :S]
        out = out[:, :S]
    return out, rnn_out


# ---------------------------------------------------------------------------
# Pure-JAX (f32) reference + parameter init
# ---------------------------------------------------------------------------

def _reference_forward(x, hn, params):
    B, S, _ = x.shape
    h = hn[0]
    outs = []
    for t in range(S):
        xt = x[:, t, :]
        gi = [xt @ params["w_ih"][g] + params["b_ih"][g] for g in range(3)]
        gh = [h @ params["w_hh"][g] + params["b_hh"][g] for g in range(3)]
        r = jax.nn.sigmoid(gi[0] + gh[0])
        z = jax.nn.sigmoid(gi[1] + gh[1])
        n = jnp.tanh(gi[2] + r * gh[2])
        h = (1.0 - z) * n + z * h
        outs.append(h)
    rnn_out = jnp.stack(outs, axis=1)                                  # (B, S, H)
    out = jnp.maximum(rnn_out @ params["w_out"] + params["b_out"], 0.0)
    return out, rnn_out


def init_params(key, inp_dim, hid_dim, out_dim):
    """Deterministic synthetic params (PyTorch-style uniform(-1/sqrt(H), 1/sqrt(H)))."""
    k = 1.0 / jnp.sqrt(jnp.float32(hid_dim))
    keys = jax.random.split(key, 6)
    u = lambda kk, shape: jax.random.uniform(kk, shape, jnp.float32, -k, k)
    return {
        # per-gate (r, z, n), stored pre-transposed so kernels do x @ W
        "w_ih": u(keys[0], (3, inp_dim, hid_dim)),
        "w_hh": u(keys[1], (3, hid_dim, hid_dim)),
        "b_ih": u(keys[2], (3, hid_dim)),
        "b_hh": u(keys[3], (3, hid_dim)),
        "w_out": u(keys[4], (hid_dim, out_dim)),     # Linear weight^T
        "b_out": u(keys[5], (out_dim,)),
    }


if __name__ == "__main__":
    B, S, INP, HID, OUT = 2, 8, 16, 32, 8

    root = jax.random.PRNGKey(0)
    kx, kh, kp = jax.random.split(root, 3)

    x = jax.random.normal(kx, (B, S, INP), jnp.float32)      # batch_first input
    hn = jax.random.normal(kh, (1, B, HID), jnp.float32)     # (num_layers=1, B, H)
    seq_lens = jnp.full((B,), S, jnp.int32)                  # unused (matches PyTorch fwd)
    params = init_params(kp, INP, HID, OUT)

    fwd = jax.jit(functools.partial(goal_rnn_forward, t_chunk=16))
    out, rnn_out = fwd(x, hn, seq_lens, params)
    jax.block_until_ready((out, rnn_out))

    out_exp, rnn_exp = _reference_forward(x, hn, params)
    assert out.shape == (B, S, OUT) and rnn_out.shape == (B, S, HID)
    # bf16 matmul operands / f32 accumulation vs pure-f32 reference tolerance.
    assert jnp.allclose(out, out_exp, rtol=5e-2, atol=5e-2)
    assert jnp.allclose(rnn_out, rnn_exp, rtol=5e-2, atol=5e-2)

    print("KERNEL_OK")
</pallas_src>

<mosaic_0001>
module attributes {stable_mosaic.version = 11 : i64} {
  func.func @_input_proj_kernel(%arg0: i32, %arg1: memref<16x16xf32, #tpu.memory_space<vmem>>, %arg2: memref<16x96xbf16, #tpu.memory_space<vmem>>, %arg3: memref<1x96xf32, #tpu.memory_space<vmem>>, %arg4: memref<16x96xbf16, #tpu.memory_space<vmem>>) attributes {dimension_semantics = [#tpu.dimension_semantics<parallel>], iteration_bounds = array<i64: 1>, scalar_prefetch = 0 : i64, scratch_operands = 0 : i64, tpu.core_type = #tpu.core_type<tc>, window_params = [{transform_indices = @transform_0, window_bounds = array<i64: 16, 16>}, {pipeline_mode = #tpu.pipeline_mode<synchronous>, transform_indices = @transform_1, window_bounds = array<i64: 16, 96>}, {pipeline_mode = #tpu.pipeline_mode<synchronous>, transform_indices = @transform_2, window_bounds = array<i64: 1, 96>}, {transform_indices = @transform_3, window_bounds = array<i64: 16, 96>}]} {
    %c0 = arith.constant 0 : index
    %c0_0 = arith.constant 0 : index
    %0 = vector.load %arg1[%c0, %c0_0] : memref<16x16xf32, #tpu.memory_space<vmem>>, vector<16x16xf32>
    %1 = arith.truncf %0 : vector<16x16xf32> to vector<16x16xbf16>
    %c0_1 = arith.constant 0 : index
    %c0_2 = arith.constant 0 : index
    %2 = vector.load %arg2[%c0_1, %c0_2] : memref<16x96xbf16, #tpu.memory_space<vmem>>, vector<16x96xbf16>
    %cst = arith.constant dense<0.000000e+00> : vector<16x96xf32>
    %3 = tpu.matmul %1, %2, %cst {dimension_numbers = #tpu.dot_dimension_numbers<[1], [0], [0], [1], [0, 0, 1, 1], [], []>} : vector<16x16xbf16>, vector<16x96xbf16>, vector<16x96xf32> -> vector<16x96xf32>
    %c0_3 = arith.constant 0 : index
    %c0_4 = arith.constant 0 : index
    %4 = vector.load %arg3[%c0_3, %c0_4] : memref<1x96xf32, #tpu.memory_space<vmem>>, vector<1x96xf32>
    %5 = vector.broadcast %4 : vector<1x96xf32> to vector<16x96xf32>
    %6 = arith.addf %3, %5 : vector<16x96xf32>
    %7 = arith.truncf %6 : vector<16x96xf32> to vector<16x96xbf16>
    %c0_5 = arith.constant 0 : index
    %c0_6 = arith.constant 0 : index
    %8 = vector.load %arg4[%c0_5, %c0_6] : memref<16x96xbf16, #tpu.memory_space<vmem>>, vector<16x96xbf16>
    tpu.vector_store %arg4[%c0_5, %c0_6], %7 {strides = array<i32>} : memref<16x96xbf16, #tpu.memory_space<vmem>>, vector<16x96xbf16>,
    return
  }
  func.func @transform_0(%arg0: i32) -> (i32, i32) {
    %c0_i32 = arith.constant 0 : i32
    %c0_i32_0 = arith.constant 0 : i32
    return %arg0, %c0_i32 : i32, i32
  }
  func.func @transform_1(%arg0: i32) -> (i32, i32) {
    %c0_i32 = arith.constant 0 : i32
    %c0_i32_0 = arith.constant 0 : i32
    %c0_i32_1 = arith.constant 0 : i32
    return %c0_i32, %c0_i32_0 : i32, i32
  }
  func.func @transform_2(%arg0: i32) -> (i32, i32) {
    %c0_i32 = arith.constant 0 : i32
    %c0_i32_0 = arith.constant 0 : i32
    %c0_i32_1 = arith.constant 0 : i32
    return %c0_i32, %c0_i32_0 : i32, i32
  }
  func.func @transform_3(%arg0: i32) -> (i32, i32) {
    %c0_i32 = arith.constant 0 : i32
    %c0_i32_0 = arith.constant 0 : i32
    return %arg0, %c0_i32 : i32, i32
  }
}

module attributes {stable_mosaic.version = 11 : i64} {
  func.func @_gru_head_kernel(%arg0: i32, %arg1: i32, %arg2: memref<2x8x96xbf16, #tpu.memory_space<vmem>>, %arg3: memref<2x32xf32, #tpu.memory_space<vmem>>, %arg4: memref<32x96xbf16, #tpu.memory_space<vmem>>, %arg5: memref<1x32xf32, #tpu.memory_space<vmem>>, %arg6: memref<32x8xbf16, #tpu.memory_space<vmem>>, %arg7: memref<1x8xf32, #tpu.memory_space<vmem>>, %arg8: memref<2x8x32xf32, #tpu.memory_space<vmem>>, %arg9: memref<2x8x8xf32, #tpu.memory_space<vmem>>, %arg10: memref<2x32xf32, #tpu.memory_space<vmem>>) attributes {dimension_semantics = [#tpu.dimension_semantics<parallel>, #tpu.dimension_semantics<arbitrary>], iteration_bounds = array<i64: 1, 1>, scalar_prefetch = 0 : i64, scratch_operands = 1 : i64, tpu.core_type = #tpu.core_type<tc>, window_params = [{transform_indices = @transform_0, window_bounds = array<i64: 2, 8, 96>}, {transform_indices = @transform_1, window_bounds = array<i64: 2, 32>}, {pipeline_mode = #tpu.pipeline_mode<synchronous>, transform_indices = @transform_2, window_bounds = array<i64: 32, 96>}, {pipeline_mode = #tpu.pipeline_mode<synchronous>, transform_indices = @transform_3, window_bounds = array<i64: 1, 32>}, {pipeline_mode = #tpu.pipeline_mode<synchronous>, transform_indices = @transform_4, window_bounds = array<i64: 32, 8>}, {pipeline_mode = #tpu.pipeline_mode<synchronous>, transform_indices = @transform_5, window_bounds = array<i64: 1, 8>}, {transform_indices = @transform_6, window_bounds = array<i64: 2, 8, 32>}, {transform_indices = @transform_7, window_bounds = array<i64: 2, 8, 8>}]} {
    %c0_i32 = arith.constant 0 : i32
    %0 = arith.cmpi eq, %arg1, %c0_i32 : i32
    %1 = arith.extui %0 : i1 to i32
    %c0_i32_0 = arith.constant 0 : i32
    %2 = arith.cmpi ne, %1, %c0_i32_0 : i32
    scf.if %2 {
      %c0_116 = arith.constant 0 : index
      %c0_117 = arith.constant 0 : index
      %353 = vector.load %arg3[%c0_116, %c0_117] : memref<2x32xf32, #tpu.memory_space<vmem>>, vector<2x32xf32>
      %c0_118 = arith.constant 0 : index
      %c0_119 = arith.constant 0 : index
      %354 = vector.load %arg10[%c0_118, %c0_119] : memref<2x32xf32, #tpu.memory_space<vmem>>, vector<2x32xf32>
      tpu.vector_store %arg10[%c0_118, %c0_119], %353 {strides = array<i32>} : memref<2x32xf32, #tpu.memory_space<vmem>>, vector<2x32xf32>,
    } else {
    }
    %c0 = arith.constant 0 : index
    %c0_1 = arith.constant 0 : index
    %3 = vector.load %arg4[%c0, %c0_1] : memref<32x96xbf16, #tpu.memory_space<vmem>>, vector<32x96xbf16>
    %c0_2 = arith.constant 0 : index
    %c0_3 = arith.constant 0 : index
    %4 = vector.load %arg5[%c0_2, %c0_3] : memref<1x32xf32, #tpu.memory_space<vmem>>, vector<1x32xf32>
    %c0_4 = arith.constant 0 : index
    %c0_5 = arith.constant 0 : index
    %5 = vector.load %arg6[%c0_4, %c0_5] : memref<32x8xbf16, #tpu.memory_space<vmem>>, vector<32x8xbf16>
    %c0_6 = arith.constant 0 : index
    %c0_7 = arith.constant 0 : index
    %6 = vector.load %arg7[%c0_6, %c0_7] : memref<1x8xf32, #tpu.memory_space<vmem>>, vector<1x8xf32>
    %c0_8 = arith.constant 0 : index
    %c0_9 = arith.constant 0 : index
    %7 = vector.load %arg10[%c0_8, %c0_9] : memref<2x32xf32, #tpu.memory_space<vmem>>, vector<2x32xf32>
    %c0_10 = arith.constant 0 : index
    %c0_11 = arith.constant 0 : index
    %c0_12 = arith.constant 0 : index
    %8 = vector.load %arg2[%c0_10, %c0_11, %c0_12] : memref<2x8x96xbf16, #tpu.memory_space<vmem>>, vector<2x1x96xbf16>
    %9 = vector.shape_cast %8 : vector<2x1x96xbf16> to vector<2x96xbf16>
    %10 = arith.extf %9 : vector<2x96xbf16> to vector<2x96xf32>
    %11 = arith.truncf %7 : vector<2x32xf32> to vector<2x32xbf16>
    %cst = arith.constant dense<0.000000e+00> : vector<2x96xf32>
    %12 = tpu.matmul %11, %3, %cst {dimension_numbers = #tpu.dot_dimension_numbers<[1], [0], [0], [1], [0, 0, 1, 1], [], []>} : vector<2x32xbf16>, vector<32x96xbf16>, vector<2x96xf32> -> vector<2x96xf32>
    %13 = vector.extract_strided_slice %10 {offsets = [0, 0], sizes = [2, 32], strides = [1, 1]} : vector<2x96xf32> to vector<2x32xf32>
    %14 = vector.extract_strided_slice %12 {offsets = [0, 0], sizes = [2, 32], strides = [1, 1]} : vector<2x96xf32> to vector<2x32xf32>
    %15 = arith.addf %13, %14 : vector<2x32xf32>
    %16 = arith.negf %15 : vector<2x32xf32>
    %17 = math.exp %16 : vector<2x32xf32>
    %cst_13 = arith.constant 1.000000e+00 : f32
    %18 = vector.broadcast %cst_13 : f32 to vector<2x32xf32>
    %19 = arith.addf %18, %17 : vector<2x32xf32>
    %20 = arith.divf %18, %19 : vector<2x32xf32>
    %21 = vector.extract_strided_slice %10 {offsets = [0, 32], sizes = [2, 32], strides = [1, 1]} : vector<2x96xf32> to vector<2x32xf32>
    %22 = vector.extract_strided_slice %12 {offsets = [0, 32], sizes = [2, 32], strides = [1, 1]} : vector<2x96xf32> to vector<2x32xf32>
    %23 = arith.addf %21, %22 : vector<2x32xf32>
    %24 = arith.negf %23 : vector<2x32xf32>
    %25 = math.exp %24 : vector<2x32xf32>
    %cst_14 = arith.constant 1.000000e+00 : f32
    %26 = vector.broadcast %cst_14 : f32 to vector<2x32xf32>
    %27 = arith.addf %26, %25 : vector<2x32xf32>
    %28 = arith.divf %26, %27 : vector<2x32xf32>
    %29 = vector.extract_strided_slice %10 {offsets = [0, 64], sizes = [2, 32], strides = [1, 1]} : vector<2x96xf32> to vector<2x32xf32>
    %30 = vector.extract_strided_slice %12 {offsets = [0, 64], sizes = [2, 32], strides = [1, 1]} : vector<2x96xf32> to vector<2x32xf32>
    %31 = vector.broadcast %4 : vector<1x32xf32> to vector<2x32xf32>
    %32 = arith.addf %30, %31 : vector<2x32xf32>
    %33 = arith.mulf %20, %32 : vector<2x32xf32>
    %34 = arith.addf %29, %33 : vector<2x32xf32>
    %35 = math.tanh %34 : vector<2x32xf32>
    %36 = arith.subf %7, %35 : vector<2x32xf32>
    %37 = arith.mulf %28, %36 : vector<2x32xf32>
    %38 = arith.addf %35, %37 : vector<2x32xf32>
    %c0_15 = arith.constant 0 : index
    %c0_16 = arith.constant 0 : index
    %c0_17 = arith.constant 0 : index
    %39 = vector.load %arg8[%c0_15, %c0_16, %c0_17] : memref<2x8x32xf32, #tpu.memory_space<vmem>>, vector<2x1x32xf32>
    %40 = vector.shape_cast %39 : vector<2x1x32xf32> to vector<2x32xf32>
    %41 = vector.shape_cast %38 : vector<2x32xf32> to vector<2x1x32xf32>
    tpu.vector_store %arg8[%c0_15, %c0_16, %c0_17], %41 {strides = array<i32>} : memref<2x8x32xf32, #tpu.memory_space<vmem>>, vector<2x1x32xf32>,
    %42 = arith.truncf %38 : vector<2x32xf32> to vector<2x32xbf16>
    %cst_18 = arith.constant dense<0.000000e+00> : vector<2x8xf32>
    %43 = tpu.matmul %42, %5, %cst_18 {dimension_numbers = #tpu.dot_dimension_numbers<[1], [0], [0], [1], [0, 0, 1, 1], [], []>} : vector<2x32xbf16>, vector<32x8xbf16>, vector<2x8xf32> -> vector<2x8xf32>
    %44 = vector.broadcast %6 : vector<1x8xf32> to vector<2x8xf32>
    %45 = arith.addf %43, %44 : vector<2x8xf32>
    %cst_19 = arith.constant 0.000000e+00 : f32
    %46 = vector.broadcast %cst_19 : f32 to vector<2x8xf32>
    %47 = arith.maximumf %45, %46 : vector<2x8xf32>
    %c0_20 = arith.constant 0 : index
    %c0_21 = arith.constant 0 : index
    %c0_22 = arith.constant 0 : index
    %48 = vector.load %arg9[%c0_20, %c0_21, %c0_22] : memref<2x8x8xf32, #tpu.memory_space<vmem>>, vector<2x1x8xf32>
    %49 = vector.shape_cast %48 : vector<2x1x8xf32> to vector<2x8xf32>
    %50 = vector.shape_cast %47 : vector<2x8xf32> to vector<2x1x8xf32>
    tpu.vector_store %arg9[%c0_20, %c0_21, %c0_22], %50 {strides = array<i32>} : memref<2x8x8xf32, #tpu.memory_space<vmem>>, vector<2x1x8xf32>,
    %c0_23 = arith.constant 0 : index
    %c1 = arith.constant 1 : index
    %c0_24 = arith.constant 0 : index
    %51 = vector.load %arg2[%c0_23, %c1, %c0_24] : memref<2x8x96xbf16, #tpu.memory_space<vmem>>, vector<2x1x96xbf16>
    %52 = vector.shape_cast %51 : vector<2x1x96xbf16> to vector<2x96xbf16>
    %53 = arith.extf %52 : vector<2x96xbf16> to vector<2x96xf32>
    %54 = arith.truncf %38 : vector<2x32xf32> to vector<2x32xbf16>
    %cst_25 = arith.constant dense<0.000000e+00> : vector<2x96xf32>
    %55 = tpu.matmul %54, %3, %cst_25 {dimension_numbers = #tpu.dot_dimension_numbers<[1], [0], [0], [1], [0, 0, 1, 1], [], []>} : vector<2x32xbf16>, vector<32x96xbf16>, vector<2x96xf32> -> vector<2x96xf32>
    %56 = vector.extract_strided_slice %53 {offsets = [0, 0], sizes = [2, 32], strides = [1, 1]} : vector<2x96xf32> to vector<2x32xf32>
    %57 = vector.extract_strided_slice %55 {offsets = [0, 0], sizes = [2, 32], strides = [1, 1]} : vector<2x96xf32> to vector<2x32xf32>
    %58 = arith.addf %56, %57 : vector<2x32xf32>
    %59 = arith.negf %58 : vector<2x32xf32>
    %60 = math.exp %59 : vector<2x32xf32>
    %cst_26 = arith.constant 1.000000e+00 : f32
    %61 = vector.broadcast %cst_26 : f32 to vector<2x32xf32>
    %62 = arith.addf %61, %60 : vector<2x32xf32>
    %63 = arith.divf %61, %62 : vector<2x32xf32>
    %64 = vector.extract_strided_slice %53 {offsets = [0, 32], sizes = [2, 32], strides = [1, 1]} : vector<2x96xf32> to vector<2x32xf32>
    %65 = vector.extract_strided_slice %55 {offsets = [0, 32], sizes = [2, 32], strides = [1, 1]} : vector<2x96xf32> to vector<2x32xf32>
    %66 = arith.addf %64, %65 : vector<2x32xf32>
    %67 = arith.negf %66 : vector<2x32xf32>
    %68 = math.exp %67 : vector<2x32xf32>
    %cst_27 = arith.constant 1.000000e+00 : f32
    %69 = vector.broadcast %cst_27 : f32 to vector<2x32xf32>
    %70 = arith.addf %69, %68 : vector<2x32xf32>
    %71 = arith.divf %69, %70 : vector<2x32xf32>
    %72 = vector.extract_strided_slice %53 {offsets = [0, 64], sizes = [2, 32], strides = [1, 1]} : vector<2x96xf32> to vector<2x32xf32>
    %73 = vector.extract_strided_slice %55 {offsets = [0, 64], sizes = [2, 32], strides = [1, 1]} : vector<2x96xf32> to vector<2x32xf32>
    %74 = vector.broadcast %4 : vector<1x32xf32> to vector<2x32xf32>
    %75 = arith.addf %73, %74 : vector<2x32xf32>
    %76 = arith.mulf %63, %75 : vector<2x32xf32>
    %77 = arith.addf %72, %76 : vector<2x32xf32>
    %78 = math.tanh %77 : vector<2x32xf32>
    %79 = arith.subf %38, %78 : vector<2x32xf32>
    %80 = arith.mulf %71, %79 : vector<2x32xf32>
    %81 = arith.addf %78, %80 : vector<2x32xf32>
    %c0_28 = arith.constant 0 : index
    %c1_29 = arith.constant 1 : index
    %c0_30 = arith.constant 0 : index
    %82 = vector.load %arg8[%c0_28, %c1_29, %c0_30] : memref<2x8x32xf32, #tpu.memory_space<vmem>>, vector<2x1x32xf32>
    %83 = vector.shape_cast %82 : vector<2x1x32xf32> to vector<2x32xf32>
    %84 = vector.shape_cast %81 : vector<2x32xf32> to vector<2x1x32xf32>
    tpu.vector_store %arg8[%c0_28, %c1_29, %c0_30], %84 {strides = array<i32>} : memref<2x8x32xf32, #tpu.memory_space<vmem>>, vector<2x1x32xf32>,
    %85 = arith.truncf %81 : vector<2x32xf32> to vector<2x32xbf16>
    %cst_31 = arith.constant dense<0.000000e+00> : vector<2x8xf32>
    %86 = tpu.matmul %85, %5, %cst_31 {dimension_numbers = #tpu.dot_dimension_numbers<[1], [0], [0], [1], [0, 0, 1, 1], [], []>} : vector<2x32xbf16>, vector<32x8xbf16>, vector<2x8xf32> -> vector<2x8xf32>
    %87 = vector.broadcast %6 : vector<1x8xf32> to vector<2x8xf32>
    %88 = arith.addf %86, %87 : vector<2x8xf32>
    %cst_32 = arith.constant 0.000000e+00 : f32
    %89 = vector.broadcast %cst_32 : f32 to vector<2x8xf32>
    %90 = arith.maximumf %88, %89 : vector<2x8xf32>
    %c0_33 = arith.constant 0 : index
    %c1_34 = arith.constant 1 : index
    %c0_35 = arith.constant 0 : index
    %91 = vector.load %arg9[%c0_33, %c1_34, %c0_35] : memref<2x8x8xf32, #tpu.memory_space<vmem>>, vector<2x1x8xf32>
    %92 = vector.shape_cast %91 : vector<2x1x8xf32> to vector<2x8xf32>
    %93 = vector.shape_cast %90 : vector<2x8xf32> to vector<2x1x8xf32>
    tpu.vector_store %arg9[%c0_33, %c1_34, %c0_35], %93 {strides = array<i32>} : memref<2x8x8xf32, #tpu.memory_space<vmem>>, vector<2x1x8xf32>,
    %c0_36 = arith.constant 0 : index
    %c2 = arith.constant 2 : index
    %c0_37 = arith.constant 0 : index
    %94 = vector.load %arg2[%c0_36, %c2, %c0_37] : memref<2x8x96xbf16, #tpu.memory_space<vmem>>, vector<2x1x96xbf16>
    %95 = vector.shape_cast %94 : vector<2x1x96xbf16> to vector<2x96xbf16>
    %96 = arith.extf %95 : vector<2x96xbf16> to vector<2x96xf32>
    %97 = arith.truncf %81 : vector<2x32xf32> to vector<2x32xbf16>
    %cst_38 = arith.constant dense<0.000000e+00> : vector<2x96xf32>
    %98 = tpu.matmul %97, %3, %cst_38 {dimension_numbers = #tpu.dot_dimension_numbers<[1], [0], [0], [1], [0, 0, 1, 1], [], []>} : vector<2x32xbf16>, vector<32x96xbf16>, vector<2x96xf32> -> vector<2x96xf32>
    %99 = vector.extract_strided_slice %96 {offsets = [0, 0], sizes = [2, 32], strides = [1, 1]} : vector<2x96xf32> to vector<2x32xf32>
    %100 = vector.extract_strided_slice %98 {offsets = [0, 0], sizes = [2, 32], strides = [1, 1]} : vector<2x96xf32> to vector<2x32xf32>
    %101 = arith.addf %99, %100 : vector<2x32xf32>
    %102 = arith.negf %101 : vector<2x32xf32>
    %103 = math.exp %102 : vector<2x32xf32>
    %cst_39 = arith.constant 1.000000e+00 : f32
    %104 = vector.broadcast %cst_39 : f32 to vector<2x32xf32>
    %105 = arith.addf %104, %103 : vector<2x32xf32>
    %106 = arith.divf %104, %105 : vector<2x32xf32>
    %107 = vector.extract_strided_slice %96 {offsets = [0, 32], sizes = [2, 32], strides = [1, 1]} : vector<2x96xf32> to vector<2x32xf32>
    %108 = vector.extract_strided_slice %98 {offsets = [0, 32], sizes = [2, 32], strides = [1, 1]} : vector<2x96xf32> to vector<2x32xf32>
    %109 = arith.addf %107, %108 : vector<2x32xf32>
    %110 = arith.negf %109 : vector<2x32xf32>
    %111 = math.exp %110 : vector<2x32xf32>
    %cst_40 = arith.constant 1.000000e+00 : f32
    %112 = vector.broadcast %cst_40 : f32 to vector<2x32xf32>
    %113 = arith.addf %112, %111 : vector<2x32xf32>
    %114 = arith.divf %112, %113 : vector<2x32xf32>
    %115 = vector.extract_strided_slice %96 {offsets = [0, 64], sizes = [2, 32], strides = [1, 1]} : vector<2x96xf32> to vector<2x32xf32>
    %116 = vector.extract_strided_slice %98 {offsets = [0, 64], sizes = [2, 32], strides = [1, 1]} : vector<2x96xf32> to vector<2x32xf32>
    %117 = vector.broadcast %4 : vector<1x32xf32> to vector<2x32xf32>
    %118 = arith.addf %116, %117 : vector<2x32xf32>
    %119 = arith.mulf %106, %118 : vector<2x32xf32>
    %120 = arith.addf %115, %119 : vector<2x32xf32>
    %121 = math.tanh %120 : vector<2x32xf32>
    %122 = arith.subf %81, %121 : vector<2x32xf32>
    %123 = arith.mulf %114, %122 : vector<2x32xf32>
    %124 = arith.addf %121, %123 : vector<2x32xf32>
    %c0_41 = arith.constant 0 : index
    %c2_42 = arith.constant 2 : index
    %c0_43 = arith.constant 0 : index
    %125 = vector.load %arg8[%c0_41, %c2_42, %c0_43] : memref<2x8x32xf32, #tpu.memory_space<vmem>>, vector<2x1x32xf32>
    %126 = vector.shape_cast %125 : vector<2x1x32xf32> to vector<2x32xf32>
    %127 = vector.shape_cast %124 : vector<2x32xf32> to vector<2x1x32xf32>
    tpu.vector_store %arg8[%c0_41, %c2_42, %c0_43], %127 {strides = array<i32>} : memref<2x8x32xf32, #tpu.memory_space<vmem>>, vector<2x1x32xf32>,
    %128 = arith.truncf %124 : vector<2x32xf32> to vector<2x32xbf16>
    %cst_44 = arith.constant dense<0.000000e+00> : vector<2x8xf32>
    %129 = tpu.matmul %128, %5, %cst_44 {dimension_numbers = #tpu.dot_dimension_numbers<[1], [0], [0], [1], [0, 0, 1, 1], [], []>} : vector<2x32xbf16>, vector<32x8xbf16>, vector<2x8xf32> -> vector<2x8xf32>
    %130 = vector.broadcast %6 : vector<1x8xf32> to vector<2x8xf32>
    %131 = arith.addf %129, %130 : vector<2x8xf32>
    %cst_45 = arith.constant 0.000000e+00 : f32
    %132 = vector.broadcast %cst_45 : f32 to vector<2x8xf32>
    %133 = arith.maximumf %131, %132 : vector<2x8xf32>
    %c0_46 = arith.constant 0 : index
    %c2_47 = arith.constant 2 : index
    %c0_48 = arith.constant 0 : index
    %134 = vector.load %arg9[%c0_46, %c2_47, %c0_48] : memref<2x8x8xf32, #tpu.memory_space<vmem>>, vector<2x1x8xf32>
    %135 = vector.shape_cast %134 : vector<2x1x8xf32> to vector<2x8xf32>
    %136 = vector.shape_cast %133 : vector<2x8xf32> to vector<2x1x8xf32>
    tpu.vector_store %arg9[%c0_46, %c2_47, %c0_48], %136 {strides = array<i32>} : memref<2x8x8xf32, #tpu.memory_space<vmem>>, vector<2x1x8xf32>,
    %c0_49 = arith.constant 0 : index
    %c3 = arith.constant 3 : index
    %c0_50 = arith.constant 0 : index
    %137 = vector.load %arg2[%c0_49, %c3, %c0_50] : memref<2x8x96xbf16, #tpu.memory_space<vmem>>, vector<2x1x96xbf16>
    %138 = vector.shape_cast %137 : vector<2x1x96xbf16> to vector<2x96xbf16>
    %139 = arith.extf %138 : vector<2x96xbf16> to vector<2x96xf32>
    %140 = arith.truncf %124 : vector<2x32xf32> to vector<2x32xbf16>
    %cst_51 = arith.constant dense<0.000000e+00> : vector<2x96xf32>
    %141 = tpu.matmul %140, %3, %cst_51 {dimension_numbers = #tpu.dot_dimension_numbers<[1], [0], [0], [1], [0, 0, 1, 1], [], []>} : vector<2x32xbf16>, vector<32x96xbf16>, vector<2x96xf32> -> vector<2x96xf32>
    %142 = vector.extract_strided_slice %139 {offsets = [0, 0], sizes = [2, 32], strides = [1, 1]} : vector<2x96xf32> to vector<2x32xf32>
    %143 = vector.extract_strided_slice %141 {offsets = [0, 0], sizes = [2, 32], strides = [1, 1]} : vector<2x96xf32> to vector<2x32xf32>
    %144 = arith.addf %142, %143 : vector<2x32xf32>
    %145 = arith.negf %144 : vector<2x32xf32>
    %146 = math.exp %145 : vector<2x32xf32>
    %cst_52 = arith.constant 1.000000e+00 : f32
    %147 = vector.broadcast %cst_52 : f32 to vector<2x32xf32>
    %148 = arith.addf %147, %146 : vector<2x32xf32>
    %149 = arith.divf %147, %148 : vector<2x32xf32>
    %150 = vector.extract_strided_slice %139 {offsets = [0, 32], sizes = [2, 32], strides = [1, 1]} : vector<2x96xf32> to vector<2x32xf32>
    %151 = vector.extract_strided_slice %141 {offsets = [0, 32], sizes = [2, 32], strides = [1, 1]} : vector<2x96xf32> to vector<2x32xf32>
    %152 = arith.addf %150, %151 : vector<2x32xf32>
    %153 = arith.negf %152 : vector<2x32xf32>
    %154 = math.exp %153 : vector<2x32xf32>
    %cst_53 = arith.constant 1.000000e+00 : f32
    %155 = vector.broadcast %cst_53 : f32 to vector<2x32xf32>
    %156 = arith.addf %155, %154 : vector<2x32xf32>
    %157 = arith.divf %155, %156 : vector<2x32xf32>
    %158 = vector.extract_strided_slice %139 {offsets = [0, 64], sizes = [2, 32], strides = [1, 1]} : vector<2x96xf32> to vector<2x32xf32>
    %159 = vector.extract_strided_slice %141 {offsets = [0, 64], sizes = [2, 32], strides = [1, 1]} : vector<2x96xf32> to vector<2x32xf32>
    %160 = vector.broadcast %4 : vector<1x32xf32> to vector<2x32xf32>
    %161 = arith.addf %159, %160 : vector<2x32xf32>
    %162 = arith.mulf %149, %161 : vector<2x32xf32>
    %163 = arith.addf %158, %162 : vector<2x32xf32>
    %164 = math.tanh %163 : vector<2x32xf32>
    %165 = arith.subf %124, %164 : vector<2x32xf32>
    %166 = arith.mulf %157, %165 : vector<2x32xf32>
    %167 = arith.addf %164, %166 : vector<2x32xf32>
    %c0_54 = arith.constant 0 : index
    %c3_55 = arith.constant 3 : index
    %c0_56 = arith.constant 0 : index
    %168 = vector.load %arg8[%c0_54, %c3_55, %c0_56] : memref<2x8x32xf32, #tpu.memory_space<vmem>>, vector<2x1x32xf32>
    %169 = vector.shape_cast %168 : vector<2x1x32xf32> to vector<2x32xf32>
    %170 = vector.shape_cast %167 : vector<2x32xf32> to vector<2x1x32xf32>
    tpu.vector_store %arg8[%c0_54, %c3_55, %c0_56], %170 {strides = array<i32>} : memref<2x8x32xf32, #tpu.memory_space<vmem>>, vector<2x1x32xf32>,
    %171 = arith.truncf %167 : vector<2x32xf32> to vector<2x32xbf16>
    %cst_57 = arith.constant dense<0.000000e+00> : vector<2x8xf32>
    %172 = tpu.matmul %171, %5, %cst_57 {dimension_numbers = #tpu.dot_dimension_numbers<[1], [0], [0], [1], [0, 0, 1, 1], [], []>} : vector<2x32xbf16>, vector<32x8xbf16>, vector<2x8xf32> -> vector<2x8xf32>
    %173 = vector.broadcast %6 : vector<1x8xf32> to vector<2x8xf32>
    %174 = arith.addf %172, %173 : vector<2x8xf32>
    %cst_58 = arith.constant 0.000000e+00 : f32
    %175 = vector.broadcast %cst_58 : f32 to vector<2x8xf32>
    %176 = arith.maximumf %174, %175 : vector<2x8xf32>
    %c0_59 = arith.constant 0 : index
    %c3_60 = arith.constant 3 : index
    %c0_61 = arith.constant 0 : index
    %177 = vector.load %arg9[%c0_59, %c3_60, %c0_61] : memref<2x8x8xf32, #tpu.memory_space<vmem>>, vector<2x1x8xf32>
    %178 = vector.shape_cast %177 : vector<2x1x8xf32> to vector<2x8xf32>
    %179 = vector.shape_cast %176 : vector<2x8xf32> to vector<2x1x8xf32>
    tpu.vector_store %arg9[%c0_59, %c3_60, %c0_61], %179 {strides = array<i32>} : memref<2x8x8xf32, #tpu.memory_space<vmem>>, vector<2x1x8xf32>,
    %c0_62 = arith.constant 0 : index
    %c4 = arith.constant 4 : index
    %c0_63 = arith.constant 0 : index
    %180 = vector.load %arg2[%c0_62, %c4, %c0_63] : memref<2x8x96xbf16, #tpu.memory_space<vmem>>, vector<2x1x96xbf16>
    %181 = vector.shape_cast %180 : vector<2x1x96xbf16> to vector<2x96xbf16>
    %182 = arith.extf %181 : vector<2x96xbf16> to vector<2x96xf32>
    %183 = arith.truncf %167 : vector<2x32xf32> to vector<2x32xbf16>
    %cst_64 = arith.constant dense<0.000000e+00> : vector<2x96xf32>
    %184 = tpu.matmul %183, %3, %cst_64 {dimension_numbers = #tpu.dot_dimension_numbers<[1], [0], [0], [1], [0, 0, 1, 1], [], []>} : vector<2x32xbf16>, vector<32x96xbf16>, vector<2x96xf32> -> vector<2x96xf32>
    %185 = vector.extract_strided_slice %182 {offsets = [0, 0], sizes = [2, 32], strides = [1, 1]} : vector<2x96xf32> to vector<2x32xf32>
    %186 = vector.extract_strided_slice %184 {offsets = [0, 0], sizes = [2, 32], strides = [1, 1]} : vector<2x96xf32> to vector<2x32xf32>
    %187 = arith.addf %185, %186 : vector<2x32xf32>
    %188 = arith.negf %187 : vector<2x32xf32>
    %189 = math.exp %188 : vector<2x32xf32>
    %cst_65 = arith.constant 1.000000e+00 : f32
    %190 = vector.broadcast %cst_65 : f32 to vector<2x32xf32>
    %191 = arith.addf %190, %189 : vector<2x32xf32>
    %192 = arith.divf %190, %191 : vector<2x32xf32>
    %193 = vector.extract_strided_slice %182 {offsets = [0, 32], sizes = [2, 32], strides = [1, 1]} : vector<2x96xf32> to vector<2x32xf32>
    %194 = vector.extract_strided_slice %184 {offsets = [0, 32], sizes = [2, 32], strides = [1, 1]} : vector<2x96xf32> to vector<2x32xf32>
    %195 = arith.addf %193, %194 : vector<2x32xf32>
    %196 = arith.negf %195 : vector<2x32xf32>
    %197 = math.exp %196 : vector<2x32xf32>
    %cst_66 = arith.constant 1.000000e+00 : f32
    %198 = vector.broadcast %cst_66 : f32 to vector<2x32xf32>
    %199 = arith.addf %198, %197 : vector<2x32xf32>
    %200 = arith.divf %198, %199 : vector<2x32xf32>
    %201 = vector.extract_strided_slice %182 {offsets = [0, 64], sizes = [2, 32], strides = [1, 1]} : vector<2x96xf32> to vector<2x32xf32>
    %202 = vector.extract_strided_slice %184 {offsets = [0, 64], sizes = [2, 32], strides = [1, 1]} : vector<2x96xf32> to vector<2x32xf32>
    %203 = vector.broadcast %4 : vector<1x32xf32> to vector<2x32xf32>
    %204 = arith.addf %202, %203 : vector<2x32xf32>
    %205 = arith.mulf %192, %204 : vector<2x32xf32>
    %206 = arith.addf %201, %205 : vector<2x32xf32>
    %207 = math.tanh %206 : vector<2x32xf32>
    %208 = arith.subf %167, %207 : vector<2x32xf32>
    %209 = arith.mulf %200, %208 : vector<2x32xf32>
    %210 = arith.addf %207, %209 : vector<2x32xf32>
    %c0_67 = arith.constant 0 : index
    %c4_68 = arith.constant 4 : index
    %c0_69 = arith.constant 0 : index
    %211 = vector.load %arg8[%c0_67, %c4_68, %c0_69] : memref<2x8x32xf32, #tpu.memory_space<vmem>>, vector<2x1x32xf32>
    %212 = vector.shape_cast %211 : vector<2x1x32xf32> to vector<2x32xf32>
    %213 = vector.shape_cast %210 : vector<2x32xf32> to vector<2x1x32xf32>
    tpu.vector_store %arg8[%c0_67, %c4_68, %c0_69], %213 {strides = array<i32>} : memref<2x8x32xf32, #tpu.memory_space<vmem>>, vector<2x1x32xf32>,
    %214 = arith.truncf %210 : vector<2x32xf32> to vector<2x32xbf16>
    %cst_70 = arith.constant dense<0.000000e+00> : vector<2x8xf32>
    %215 = tpu.matmul %214, %5, %cst_70 {dimension_numbers = #tpu.dot_dimension_numbers<[1], [0], [0], [1], [0, 0, 1, 1], [], []>} : vector<2x32xbf16>, vector<32x8xbf16>, vector<2x8xf32> -> vector<2x8xf32>
    %216 = vector.broadcast %6 : vector<1x8xf32> to vector<2x8xf32>
    %217 = arith.addf %215, %216 : vector<2x8xf32>
    %cst_71 = arith.constant 0.000000e+00 : f32
    %218 = vector.broadcast %cst_71 : f32 to vector<2x8xf32>
    %219 = arith.maximumf %217, %218 : vector<2x8xf32>
    %c0_72 = arith.constant 0 : index
    %c4_73 = arith.constant 4 : index
    %c0_74 = arith.constant 0 : index
    %220 = vector.load %arg9[%c0_72, %c4_73, %c0_74] : memref<2x8x8xf32, #tpu.memory_space<vmem>>, vector<2x1x8xf32>
    %221 = vector.shape_cast %220 : vector<2x1x8xf32> to vector<2x8xf32>
    %222 = vector.shape_cast %219 : vector<2x8xf32> to vector<2x1x8xf32>
    tpu.vector_store %arg9[%c0_72, %c4_73, %c0_74], %222 {strides = array<i32>} : memref<2x8x8xf32, #tpu.memory_space<vmem>>, vector<2x1x8xf32>,
    %c0_75 = arith.constant 0 : index
    %c5 = arith.constant 5 : index
    %c0_76 = arith.constant 0 : index
    %223 = vector.load %arg2[%c0_75, %c5, %c0_76] : memref<2x8x96xbf16, #tpu.memory_space<vmem>>, vector<2x1x96xbf16>
    %224 = vector.shape_cast %223 : vector<2x1x96xbf16> to vector<2x96xbf16>
    %225 = arith.extf %224 : vector<2x96xbf16> to vector<2x96xf32>
    %226 = arith.truncf %210 : vector<2x32xf32> to vector<2x32xbf16>
    %cst_77 = arith.constant dense<0.000000e+00> : vector<2x96xf32>
    %227 = tpu.matmul %226, %3, %cst_77 {dimension_numbers = #tpu.dot_dimension_numbers<[1], [0], [0], [1], [0, 0, 1, 1], [], []>} : vector<2x32xbf16>, vector<32x96xbf16>, vector<2x96xf32> -> vector<2x96xf32>
    %228 = vector.extract_strided_slice %225 {offsets = [0, 0], sizes = [2, 32], strides = [1, 1]} : vector<2x96xf32> to vector<2x32xf32>
    %229 = vector.extract_strided_slice %227 {offsets = [0, 0], sizes = [2, 32], strides = [1, 1]} : vector<2x96xf32> to vector<2x32xf32>
    %230 = arith.addf %228, %229 : vector<2x32xf32>
    %231 = arith.negf %230 : vector<2x32xf32>
    %232 = math.exp %231 : vector<2x32xf32>
    %cst_78 = arith.constant 1.000000e+00 : f32
    %233 = vector.broadcast %cst_78 : f32 to vector<2x32xf32>
    %234 = arith.addf %233, %232 : vector<2x32xf32>
    %235 = arith.divf %233, %234 : vector<2x32xf32>
    %236 = vector.extract_strided_slice %225 {offsets = [0, 32], sizes = [2, 32], strides = [1, 1]} : vector<2x96xf32> to vector<2x32xf32>
    %237 = vector.extract_strided_slice %227 {offsets = [0, 32], sizes = [2, 32], strides = [1, 1]} : vector<2x96xf32> to vector<2x32xf32>
    %238 = arith.addf %236, %237 : vector<2x32xf32>
    %239 = arith.negf %238 : vector<2x32xf32>
    %240 = math.exp %239 : vector<2x32xf32>
    %cst_79 = arith.constant 1.000000e+00 : f32
    %241 = vector.broadcast %cst_79 : f32 to vector<2x32xf32>
    %242 = arith.addf %241, %240 : vector<2x32xf32>
    %243 = arith.divf %241, %242 : vector<2x32xf32>
    %244 = vector.extract_strided_slice %225 {offsets = [0, 64], sizes = [2, 32], strides = [1, 1]} : vector<2x96xf32> to vector<2x32xf32>
    %245 = vector.extract_strided_slice %227 {offsets = [0, 64], sizes = [2, 32], strides = [1, 1]} : vector<2x96xf32> to vector<2x32xf32>
    %246 = vector.broadcast %4 : vector<1x32xf32> to vector<2x32xf32>
    %247 = arith.addf %245, %246 : vector<2x32xf32>
    %248 = arith.mulf %235, %247 : vector<2x32xf32>
    %249 = arith.addf %244, %248 : vector<2x32xf32>
    %250 = math.tanh %249 : vector<2x32xf32>
    %251 = arith.subf %210, %250 : vector<2x32xf32>
    %252 = arith.mulf %243, %251 : vector<2x32xf32>
    %253 = arith.addf %250, %252 : vector<2x32xf32>
    %c0_80 = arith.constant 0 : index
    %c5_81 = arith.constant 5 : index
    %c0_82 = arith.constant 0 : index
    %254 = vector.load %arg8[%c0_80, %c5_81, %c0_82] : memref<2x8x32xf32, #tpu.memory_space<vmem>>, vector<2x1x32xf32>
    %255 = vector.shape_cast %254 : vector<2x1x32xf32> to vector<2x32xf32>
    %256 = vector.shape_cast %253 : vector<2x32xf32> to vector<2x1x32xf32>
    tpu.vector_store %arg8[%c0_80, %c5_81, %c0_82], %256 {strides = array<i32>} : memref<2x8x32xf32, #tpu.memory_space<vmem>>, vector<2x1x32xf32>,
    %257 = arith.truncf %253 : vector<2x32xf32> to vector<2x32xbf16>
    %cst_83 = arith.constant dense<0.000000e+00> : vector<2x8xf32>
    %258 = tpu.matmul %257, %5, %cst_83 {dimension_numbers = #tpu.dot_dimension_numbers<[1], [0], [0], [1], [0, 0, 1, 1], [], []>} : vector<2x32xbf16>, vector<32x8xbf16>, vector<2x8xf32> -> vector<2x8xf32>
    %259 = vector.broadcast %6 : vector<1x8xf32> to vector<2x8xf32>
    %260 = arith.addf %258, %259 : vector<2x8xf32>
    %cst_84 = arith.constant 0.000000e+00 : f32
    %261 = vector.broadcast %cst_84 : f32 to vector<2x8xf32>
    %262 = arith.maximumf %260, %261 : vector<2x8xf32>
    %c0_85 = arith.constant 0 : index
    %c5_86 = arith.constant 5 : index
    %c0_87 = arith.constant 0 : index
    %263 = vector.load %arg9[%c0_85, %c5_86, %c0_87] : memref<2x8x8xf32, #tpu.memory_space<vmem>>, vector<2x1x8xf32>
    %264 = vector.shape_cast %263 : vector<2x1x8xf32> to vector<2x8xf32>
    %265 = vector.shape_cast %262 : vector<2x8xf32> to vector<2x1x8xf32>
    tpu.vector_store %arg9[%c0_85, %c5_86, %c0_87], %265 {strides = array<i32>} : memref<2x8x8xf32, #tpu.memory_space<vmem>>, vector<2x1x8xf32>,
    %c0_88 = arith.constant 0 : index
    %c6 = arith.constant 6 : index
    %c0_89 = arith.constant 0 : index
    %266 = vector.load %arg2[%c0_88, %c6, %c0_89] : memref<2x8x96xbf16, #tpu.memory_space<vmem>>, vector<2x1x96xbf16>
    %267 = vector.shape_cast %266 : vector<2x1x96xbf16> to vector<2x96xbf16>
    %268 = arith.extf %267 : vector<2x96xbf16> to vector<2x96xf32>
    %269 = arith.truncf %253 : vector<2x32xf32> to vector<2x32xbf16>
    %cst_90 = arith.constant dense<0.000000e+00> : vector<2x96xf32>
    %270 = tpu.matmul %269, %3, %cst_90 {dimension_numbers = #tpu.dot_dimension_numbers<[1], [0], [0], [1], [0, 0, 1, 1], [], []>} : vector<2x32xbf16>, vector<32x96xbf16>, vector<2x96xf32> -> vector<2x96xf32>
    %271 = vector.extract_strided_slice %268 {offsets = [0, 0], sizes = [2, 32], strides = [1, 1]} : vector<2x96xf32> to vector<2x32xf32>
    %272 = vector.extract_strided_slice %270 {offsets = [0, 0], sizes = [2, 32], strides = [1, 1]} : vector<2x96xf32> to vector<2x32xf32>
    %273 = arith.addf %271, %272 : vector<2x32xf32>
    %274 = arith.negf %273 : vector<2x32xf32>
    %275 = math.exp %274 : vector<2x32xf32>
    %cst_91 = arith.constant 1.000000e+00 : f32
    %276 = vector.broadcast %cst_91 : f32 to vector<2x32xf32>
    %277 = arith.addf %276, %275 : vector<2x32xf32>
    %278 = arith.divf %276, %277 : vector<2x32xf32>
    %279 = vector.extract_strided_slice %268 {offsets = [0, 32], sizes = [2, 32], strides = [1, 1]} : vector<2x96xf32> to vector<2x32xf32>
    %280 = vector.extract_strided_slice %270 {offsets = [0, 32], sizes = [2, 32], strides = [1, 1]} : vector<2x96xf32> to vector<2x32xf32>
    %281 = arith.addf %279, %280 : vector<2x32xf32>
    %282 = arith.negf %281 : vector<2x32xf32>
    %283 = math.exp %282 : vector<2x32xf32>
    %cst_92 = arith.constant 1.000000e+00 : f32
    %284 = vector.broadcast %cst_92 : f32 to vector<2x32xf32>
    %285 = arith.addf %284, %283 : vector<2x32xf32>
    %286 = arith.divf %284, %285 : vector<2x32xf32>
    %287 = vector.extract_strided_slice %268 {offsets = [0, 64], sizes = [2, 32], strides = [1, 1]} : vector<2x96xf32> to vector<2x32xf32>
    %288 = vector.extract_strided_slice %270 {offsets = [0, 64], sizes = [2, 32], strides = [1, 1]} : vector<2x96xf32> to vector<2x32xf32>
    %289 = vector.broadcast %4 : vector<1x32xf32> to vector<2x32xf32>
    %290 = arith.addf %288, %289 : vector<2x32xf32>
    %291 = arith.mulf %278, %290 : vector<2x32xf32>
    %292 = arith.addf %287, %291 : vector<2x32xf32>
    %293 = math.tanh %292 : vector<2x32xf32>
    %294 = arith.subf %253, %293 : vector<2x32xf32>
    %295 = arith.mulf %286, %294 : vector<2x32xf32>
    %296 = arith.addf %293, %295 : vector<2x32xf32>
    %c0_93 = arith.constant 0 : index
    %c6_94 = arith.constant 6 : index
    %c0_95 = arith.constant 0 : index
    %297 = vector.load %arg8[%c0_93, %c6_94, %c0_95] : memref<2x8x32xf32, #tpu.memory_space<vmem>>, vector<2x1x32xf32>
    %298 = vector.shape_cast %297 : vector<2x1x32xf32> to vector<2x32xf32>
    %299 = vector.shape_cast %296 : vector<2x32xf32> to vector<2x1x32xf32>
    tpu.vector_store %arg8[%c0_93, %c6_94, %c0_95], %299 {strides = array<i32>} : memref<2x8x32xf32, #tpu.memory_space<vmem>>, vector<2x1x32xf32>,
    %300 = arith.truncf %296 : vector<2x32xf32> to vector<2x32xbf16>
    %cst_96 = arith.constant dense<0.000000e+00> : vector<2x8xf32>
    %301 = tpu.matmul %300, %5, %cst_96 {dimension_numbers = #tpu.dot_dimension_numbers<[1], [0], [0], [1], [0, 0, 1, 1], [], []>} : vector<2x32xbf16>, vector<32x8xbf16>, vector<2x8xf32> -> vector<2x8xf32>
    %302 = vector.broadcast %6 : vector<1x8xf32> to vector<2x8xf32>
    %303 = arith.addf %301, %302 : vector<2x8xf32>
    %cst_97 = arith.constant 0.000000e+00 : f32
    %304 = vector.broadcast %cst_97 : f32 to vector<2x8xf32>
    %305 = arith.maximumf %303, %304 : vector<2x8xf32>
    %c0_98 = arith.constant 0 : index
    %c6_99 = arith.constant 6 : index
    %c0_100 = arith.constant 0 : index
    %306 = vector.load %arg9[%c0_98, %c6_99, %c0_100] : memref<2x8x8xf32, #tpu.memory_space<vmem>>, vector<2x1x8xf32>
    %307 = vector.shape_cast %306 : vector<2x1x8xf32> to vector<2x8xf32>
    %308 = vector.shape_cast %305 : vector<2x8xf32> to vector<2x1x8xf32>
    tpu.vector_store %arg9[%c0_98, %c6_99, %c0_100], %308 {strides = array<i32>} : memref<2x8x8xf32, #tpu.memory_space<vmem>>, vector<2x1x8xf32>,
    %c0_101 = arith.constant 0 : index
    %c7 = arith.constant 7 : index
    %c0_102 = arith.constant 0 : index
    %309 = vector.load %arg2[%c0_101, %c7, %c0_102] : memref<2x8x96xbf16, #tpu.memory_space<vmem>>, vector<2x1x96xbf16>
    %310 = vector.shape_cast %309 : vector<2x1x96xbf16> to vector<2x96xbf16>
    %311 = arith.extf %310 : vector<2x96xbf16> to vector<2x96xf32>
    %312 = arith.truncf %296 : vector<2x32xf32> to vector<2x32xbf16>
    %cst_103 = arith.constant dense<0.000000e+00> : vector<2x96xf32>
    %313 = tpu.matmul %312, %3, %cst_103 {dimension_numbers = #tpu.dot_dimension_numbers<[1], [0], [0], [1], [0, 0, 1, 1], [], []>} : vector<2x32xbf16>, vector<32x96xbf16>, vector<2x96xf32> -> vector<2x96xf32>
    %314 = vector.extract_strided_slice %311 {offsets = [0, 0], sizes = [2, 32], strides = [1, 1]} : vector<2x96xf32> to vector<2x32xf32>
    %315 = vector.extract_strided_slice %313 {offsets = [0, 0], sizes = [2, 32], strides = [1, 1]} : vector<2x96xf32> to vector<2x32xf32>
    %316 = arith.addf %314, %315 : vector<2x32xf32>
    %317 = arith.negf %316 : vector<2x32xf32>
    %318 = math.exp %317 : vector<2x32xf32>
    %cst_104 = arith.constant 1.000000e+00 : f32
    %319 = vector.broadcast %cst_104 : f32 to vector<2x32xf32>
    %320 = arith.addf %319, %318 : vector<2x32xf32>
    %321 = arith.divf %319, %320 : vector<2x32xf32>
    %322 = vector.extract_strided_slice %311 {offsets = [0, 32], sizes = [2, 32], strides = [1, 1]} : vector<2x96xf32> to vector<2x32xf32>
    %323 = vector.extract_strided_slice %313 {offsets = [0, 32], sizes = [2, 32], strides = [1, 1]} : vector<2x96xf32> to vector<2x32xf32>
    %324 = arith.addf %322, %323 : vector<2x32xf32>
    %325 = arith.negf %324 : vector<2x32xf32>
    %326 = math.exp %325 : vector<2x32xf32>
    %cst_105 = arith.constant 1.000000e+00 : f32
    %327 = vector.broadcast %cst_105 : f32 to vector<2x32xf32>
    %328 = arith.addf %327, %326 : vector<2x32xf32>
    %329 = arith.divf %327, %328 : vector<2x32xf32>
    %330 = vector.extract_strided_slice %311 {offsets = [0, 64], sizes = [2, 32], strides = [1, 1]} : vector<2x96xf32> to vector<2x32xf32>
    %331 = vector.extract_strided_slice %313 {offsets = [0, 64], sizes = [2, 32], strides = [1, 1]} : vector<2x96xf32> to vector<2x32xf32>
    %332 = vector.broadcast %4 : vector<1x32xf32> to vector<2x32xf32>
    %333 = arith.addf %331, %332 : vector<2x32xf32>
    %334 = arith.mulf %321, %333 : vector<2x32xf32>
    %335 = arith.addf %330, %334 : vector<2x32xf32>
    %336 = math.tanh %335 : vector<2x32xf32>
    %337 = arith.subf %296, %336 : vector<2x32xf32>
    %338 = arith.mulf %329, %337 : vector<2x32xf32>
    %339 = arith.addf %336, %338 : vector<2x32xf32>
    %c0_106 = arith.constant 0 : index
    %c7_107 = arith.constant 7 : index
    %c0_108 = arith.constant 0 : index
    %340 = vector.load %arg8[%c0_106, %c7_107, %c0_108] : memref<2x8x32xf32, #tpu.memory_space<vmem>>, vector<2x1x32xf32>
    %341 = vector.shape_cast %340 : vector<2x1x32xf32> to vector<2x32xf32>
    %342 = vector.shape_cast %339 : vector<2x32xf32> to vector<2x1x32xf32>
    tpu.vector_store %arg8[%c0_106, %c7_107, %c0_108], %342 {strides = array<i32>} : memref<2x8x32xf32, #tpu.memory_space<vmem>>, vector<2x1x32xf32>,
    %343 = arith.truncf %339 : vector<2x32xf32> to vector<2x32xbf16>
    %cst_109 = arith.constant dense<0.000000e+00> : vector<2x8xf32>
    %344 = tpu.matmul %343, %5, %cst_109 {dimension_numbers = #tpu.dot_dimension_numbers<[1], [0], [0], [1], [0, 0, 1, 1], [], []>} : vector<2x32xbf16>, vector<32x8xbf16>, vector<2x8xf32> -> vector<2x8xf32>
    %345 = vector.broadcast %6 : vector<1x8xf32> to vector<2x8xf32>
    %346 = arith.addf %344, %345 : vector<2x8xf32>
    %cst_110 = arith.constant 0.000000e+00 : f32
    %347 = vector.broadcast %cst_110 : f32 to vector<2x8xf32>
    %348 = arith.maximumf %346, %347 : vector<2x8xf32>
    %c0_111 = arith.constant 0 : index
    %c7_112 = arith.constant 7 : index
    %c0_113 = arith.constant 0 : index
    %349 = vector.load %arg9[%c0_111, %c7_112, %c0_113] : memref<2x8x8xf32, #tpu.memory_space<vmem>>, vector<2x1x8xf32>
    %350 = vector.shape_cast %349 : vector<2x1x8xf32> to vector<2x8xf32>
    %351 = vector.shape_cast %348 : vector<2x8xf32> to vector<2x1x8xf32>
    tpu.vector_store %arg9[%c0_111, %c7_112, %c0_113], %351 {strides = array<i32>} : memref<2x8x8xf32, #tpu.memory_space<vmem>>, vector<2x1x8xf32>,
    %c0_114 = arith.constant 0 : index
    %c0_115 = arith.constant 0 : index
    %352 = vector.load %arg10[%c0_114, %c0_115] : memref<2x32xf32, #tpu.memory_space<vmem>>, vector<2x32xf32>
    tpu.vector_store %arg10[%c0_114, %c0_115], %339 {strides = array<i32>} : memref<2x32xf32, #tpu.memory_space<vmem>>, vector<2x32xf32>,
    return
  }
  func.func @transform_0(%arg0: i32, %arg1: i32) -> (i32, i32, i32) {
    %c0_i32 = arith.constant 0 : i32
    %c0_i32_0 = arith.constant 0 : i32
    return %arg0, %arg1, %c0_i32 : i32, i32, i32
  }
  func.func @transform_1(%arg0: i32, %arg1: i32) -> (i32, i32) {
    %c0_i32 = arith.constant 0 : i32
    %c0_i32_0 = arith.constant 0 : i32
    return %arg0, %c0_i32 : i32, i32
  }
  func.func @transform_2(%arg0: i32, %arg1: i32) -> (i32, i32) {
    %c0_i32 = arith.constant 0 : i32
    %c0_i32_0 = arith.constant 0 : i32
    %c0_i32_1 = arith.constant 0 : i32
    return %c0_i32, %c0_i32_0 : i32, i32
  }
  func.func @transform_3(%arg0: i32, %arg1: i32) -> (i32, i32) {
    %c0_i32 = arith.constant 0 : i32
    %c0_i32_0 = arith.constant 0 : i32
    %c0_i32_1 = arith.constant 0 : i32
    return %c0_i32, %c0_i32_0 : i32, i32
  }
  func.func @transform_4(%arg0: i32, %arg1: i32) -> (i32, i32) {
    %c0_i32 = arith.constant 0 : i32
    %c0_i32_0 = arith.constant 0 : i32
    %c0_i32_1 = arith.constant 0 : i32
    return %c0_i32, %c0_i32_0 : i32, i32
  }
  func.func @transform_5(%arg0: i32, %arg1: i32) -> (i32, i32) {
    %c0_i32 = arith.constant 0 : i32
    %c0_i32_0 = arith.constant 0 : i32
    %c0_i32_1 = arith.constant 0 : i32
    return %c0_i32, %c0_i32_0 : i32, i32
  }
  func.func @transform_6(%arg0: i32, %arg1: i32) -> (i32, i32, i32) {
    %c0_i32 = arith.constant 0 : i32
    %c0_i32_0 = arith.constant 0 : i32
    return %arg0, %arg1, %c0_i32 : i32, i32, i32
  }
  func.func @transform_7(%arg0: i32, %arg1: i32) -> (i32, i32, i32) {
    %c0_i32 = arith.constant 0 : i32
    %c0_i32_0 = arith.constant 0 : i32
    return %arg0, %arg1, %c0_i32 : i32, i32, i32
  }
}

</mosaic_0001>

<bundles_post_ra>
// kernel: goal_rnn_forward.2
= control target key start
LH: loop header
LB: loop body
LE: loop exit
PB: predicated region body
PF: predicated region fallthrough
CT: control target
= control target key end

     0   :  { %vm30_vm0 = vcmask 130048   ;;  %vm50_vm1 = vcmask 781312   ;;  %s102_s1 = inlined_call_operand.vmem [shape: bf16[16,96], index: 1, kind: input, shape index: {}]   ;;  %s103_s0 = inlined_call_operand.vmem [shape: f32[16,16], index: 0, kind: input, shape index: {}]   ;;  %s104_s2 = inlined_call_operand.vmem [shape: f32[1,96], index: 2, kind: input, shape index: {}]   ;;  %s105_s3 = inlined_call_operand.vmem [shape: bf16[16,96], index: 3, kind: output, shape index: {}]  }
   0x1   :  { %v62_v0 = vld [vmem:[%s102_s1] sm:$0xff]  ;;  %v16_v2 = vld [vmem:[%s103_s0 + $0x8] sm:$0xff] }
   0x2   :  { %v15_v1 = vld [vmem:[%s103_s0] sm:$0xff]  ;;  %41 = vmatpush.bf16.msra.mxu0 %v62_v0 }
   0x3   :  { %v17_v3 = vpack.c.bf16 %v16_v2, %v15_v1  ;;  %v63_v4 = vld [vmem:[%s104_s2] ss:$0 sm:$0xff] }
   0x5   :  { %61 = vmatmul.msk.bf16.vlgmr.msra.gmra.mxu0 %vm30_vm0, %v17_v3 }
  0x82   :  { %v43_v5 = vpop.f32.mrf.mxu0 }
  0x83   :  { %v44_v6 = vadd.f32 %v63_v4, %v43_v5 }
  0x85   :  { %v48_v7 = vpack.c.bf16 %v44_v6, %v44_v6 }
  0x87   :  { %51 = vst.msk [vmem:[%s105_s3] sm:$0xf] %vm50_vm1, %v48_v7 }
  0x8a   :  { %v45_v8 = vpop.f32.mrf.mxu0 }
  0x8b   :  { %v46_v9 = vadd.f32 %v63_v4, %v45_v8 }
  0x8d   :  { %v49_v10 = vpack.c.bf16 %v46_v9, %v46_v9 }
  0x8f   :  { %52 = vst.msk [vmem:[%s105_s3 + $0x4] sm:$0xf] %vm50_vm1, %v49_v10 }

// kernel: goal_rnn_forward.3
= control target key start
LH: loop header
LB: loop body
LE: loop exit
PB: predicated region body
PF: predicated region fallthrough
CT: control target
= control target key end

     0   :  { %13 = vsyncpa [#allocation4], 0  ;;  %vm33_vm0 = vcmask 254976   ;;  %s2041_s0 = inlined_call_operand.vmem [shape: bf16[2,8,96], index: 0, kind: input, shape index: {}]   ;;  %s2042_s1 = inlined_call_operand.vmem [shape: f32[2,32], index: 1, kind: input, shape index: {}]   ;;  %s2043_s2 = inlined_call_operand.vmem [shape: bf16[32,96], index: 2, kind: input, shape index: {}]   ;;  %s2044_s3 = inlined_call_operand.vmem [shape: f32[1,32], index: 3, kind: input, shape index: {}]   ;;  %s2045_s4 = inlined_call_operand.vmem [shape: bf16[32,8], index: 4, kind: input, shape index: {}]   ;;  %s2046_s5 = inlined_call_operand.vmem [shape: f32[1,8], index: 5, kind: input, shape index: {}]   ;;  %s2047_s6 = inlined_call_operand.hbm [shape: f32[2,8,32], index: 6, kind: output, shape index: {0}]   ;;  %s2048_s7 = inlined_call_operand.hbm [shape: f32[2,8,8], index: 7, kind: output, shape index: {1}]  }
   0x1   :  { %v1667_v0 = vld [vmem:[%s2043_s2 + $0x8] sm:$0xff]  ;;  %v32_v1 = vld [vmem:[%s2042_s1] sm:$0x3] }
   0x2   :  { %34 = vst.msk [vmem:[#allocation2] sm:$0x3] %vm33_vm0, %v32_v1  ;;  %v1466_v2 = vld [vmem:[%s2044_s3] ss:$0 sm:$0xff]  ;;  %73 = vmatpush.bf16.msra.mxu0 %v1667_v0  ;;  %251 = vmatpush.bf16.msra.mxu2 %v1667_v0 }
   0x3   :  { %v1679_v3 = vld [vmem:[%s2043_s2] sm:$0xff] }
   0x4   :  { %14 = vsyncpa [#allocation6], 0  ;;  %s1617_s9 = smov 64   ;;  %vm63_vm1 = vcmask 261120   ;;  %v46_v11 = vld [vmem:[%s2041_s0] sm:$0x1] }
   0x5   :  { %126 = vrot.lane.b32.xlu0 %v1466_v2, %s1617_s9  ;;  %v47_v12 = vld [vmem:[%s2041_s0 + $0x4] sm:$0x1]  ;;  %v48_v13 = vunpack.c.l.bf16 %v46_v11  ;;  %vm155_vm10 = vcmask 1041409   ;;  %s1618_s11 = smov 32   ;;  %v1719_v63 = vld [vmem:[%s2045_s4 + $0x8] sm:$0xff]  ;;  %vm238_vm11 = vcmask 57344  }
   0x6   :  { %74 = vmatpush.bf16.msra.mxu0 %v1679_v3  ;;  %252 = vmatpush.bf16.msra.mxu2 %v1679_v3  ;;  %v49_v14 = vunpack.c.l.bf16 %v47_v12  ;;  %v1725_v1 = vld [vmem:[%s2045_s4] sm:$0xff]  ;;  %s1619_s21 = smov 96   ;;  %s1377_s23 = sshll.u32 %s2047_s6, 4  ;;  %s1378_s23 = int_to_ptr.hbm [resolvable:$true] %s1377_s23 }
   0x7   :  { %227 = vmatpush.bf16.msra.mxu1 %v1719_v63  ;;  %386 = vmatpush.bf16.msra.mxu3 %v1719_v63  ;;  %s1621_s24 = smov 128   ;;  %s1622_s25 = smov 8  }
   0x8   :  { %s1623_s26 = smov [#allocation5]   ;;  %s1390_s30 = sshll.u32 %s2048_s7, 4  ;;  %s1391_s30 = int_to_ptr.hbm [resolvable:$true] %s1390_s30 }
   0x9   :  { %v1687_v4 = vld [vmem:[#allocation2] sm:$0x3]  ;;  %s1388_s27 = sshll.u32 %s1623_s26, 4  ;;  %s1389_s27 = int_to_ptr.vmem [resolvable:$true] %s1388_s27 }
   0xa   :  { %409 = vmatpush.bf16.msrb.mxu0 %v1667_v0  ;;  %570 = vmatpush.bf16.msrb.mxu2 %v1667_v0  ;;  %v50_v5 = vpack.c.bf16 %v1687_v4, %v1687_v4 }
   0xb   :  { %228 = vmatpush.bf16.msra.mxu1 %v1725_v1  ;;  %387 = vmatpush.bf16.msra.mxu3 %v1725_v1 }
   0xc   :  { %1415 = vmatmul.msk.bf16.vlgmr.msra.gmra.mxu0 %vm63_vm1, %v50_v5 }
   0xe   :  { %571 = vmatpush.bf16.msrb.mxu2 %v1679_v3  ;;  %410 = vmatpush.bf16.msrb.mxu0 %v1679_v3 }
   0xf   :  { %547 = vmatpush.bf16.msrb.mxu1 %v1719_v63  ;;  %708 = vmatpush.bf16.msrb.mxu3 %v1719_v63 }
  0x12   :  { %731 = vmatpush.bf16.msra.mxu0 %v1667_v0 }
  0x13   :  { %548 = vmatpush.bf16.msrb.mxu1 %v1725_v1  ;;  %709 = vmatpush.bf16.msrb.mxu3 %v1725_v1 }
  0x16   :  { %732 = vmatpush.bf16.msra.mxu0 %v1679_v3 }
  0x77   :  { %v1696_v6 = vpop.permute.xlu0 %126 }
  0x89   :  { %v76_v7 = vpop.f32.mrf.mxu0 }
  0x8a   :  { %v129_v8 = vadd.f32 %v1696_v6, %v76_v7  ;;  %v81_v15 = vrot.slane %v76_v7, 1  ;;  %v84_v16 = vadd.f32 %v76_v7, %v48_v13 }
  0x8c   :  { %132 = vrot.lane.b32.xlu1 %v129_v8, %s1617_s9  ;;  %v131_v9 = vrot.slane %v129_v8, 1  ;;  %v85_v17 = vadd.f32 %v81_v15, %v49_v14  ;;  %v1416_v18 = vmul.f32 -1.442695, %v84_v16  ;;  %v1753_v16 = vld [vmem:[%s2046_s5] ss:$0 sm:$0xff] }
  0x8e   :  { %134 = vrot.lane.b32.xlu0 %v131_v9, %s1617_s9  ;;  %v1417_v19 = vmul.f32 -1.442695, %v85_v17  ;;  %1468 = vpow2.f32 %v1416_v18 }
  0x90   :  { %1470 = vpow2.f32 %v1417_v19 }
  0x91   :  { %v78_v10 = vpop.f32.mrf.mxu0 }
  0x94   :  { %v1469_v20 = vpop.eup %1468 }
  0x95   :  { %v92_v22 = vadd.f32 1.0, %v1469_v20 }
  0x96   :  { %v1471_v21 = vpop.eup %1470 }
  0x97   :  { %v93_v23 = vadd.f32 1.0, %v1471_v21  ;;  %1472 = vrcp.f32 %v92_v22  ;;  %v105_v33 = vand.u32 2147483648, %v92_v22  ;;  %vm99_vm3 = vweird.f32 %v92_v22 }
  0x98   :  { %v103_v34 = vand.u32 2147483647, %v92_v22 }
  0x99   :  { %1474 = vrcp.f32 %v93_v23  ;;  %v120_v36 = vand.u32 2147483648, %v93_v23  ;;  %vm114_vm6 = vweird.f32 %v93_v23  ;;  %v118_v38 = vand.u32 2147483647, %v93_v23 }
  0x9a   :  { %v106_v39 = vor.u32 1.1754944e-38, %v105_v33  ;;  %vm104_vm8 = vcmp.eq.f32.partialorder %v103_v34, 8.507059e+37 }
  0x9b   :  { %v121_v43 = vor.u32 1.1754944e-38, %v120_v36  ;;  %vm119_vm9 = vcmp.eq.f32.partialorder %v118_v38, 8.507059e+37 }
  0x9d   :  { %v1473_v24 = vpop.eup %1472 }
  0x9e   :  { %v95_v26 = vmul.f32 %v1473_v24, %v92_v22  ;;  %vm100_vm2 = vweird.f32 %v1473_v24 }
  0x9f   :  { %v1475_v25 = vpop.eup %1474  ;;  %vm101_vm5 = vmor %vm99_vm3, %vm100_vm2 }
  0xa0   :  { %v110_v27 = vmul.f32 %v1475_v25, %v93_v23  ;;  %v96_v28 = vsub.f32 1.0, %v95_v26  ;;  %vm115_vm4 = vweird.f32 %v1475_v25  ;;  %v241_v26 = vld [vmem:[%s2041_s0] sm:$0x1] }
  0xa1   :  { %vm116_vm7 = vmor %vm114_vm6, %vm115_vm4 }
  0xa2   :  { %v111_v29 = vsub.f32 1.0, %v110_v27  ;;  %v97_v30 = vmul.f32 %v1473_v24, %v96_v28  ;;  %v243_v27 = vunpack.c.l.bf16 %v241_v26 }
  0xa4   :  { %v112_v31 = vmul.f32 %v1475_v25, %v111_v29  ;;  %v98_v32 = vadd.f32 %v1473_v24, %v97_v30 }
  0xa6   :  { %v113_v35 = vadd.f32 %v1475_v25, %v112_v31  ;;  %v102_v37 = vsel %vm101_vm5, %v1473_v24, %v98_v32  ;;  %v242_v32 = vld [vmem:[%s2041_s0 + $0x4] sm:$0x1] }
  0xa7   :  { %v107_v42 = vsel %vm104_vm8, %v106_v39, %v102_v37  ;;  %v244_v34 = vunpack.c.l.bf16 %v242_v32 }
  0xa8   :  { %v117_v40 = vsel %vm116_vm7, %v1475_v25, %v113_v35 }
  0xa9   :  { %v122_v46 = vsel %vm119_vm9, %v121_v43, %v117_v40 }
  0xfe   :  { %v133_v41 = vpop.permute.xlu1 %132 }
  0xff   :  { %v138_v44 = vmul.f32 %v133_v41, %v107_v42 }
 0x100   :  { %v135_v45 = vpop.permute.xlu0 %134 }
 0x101   :  { %v139_v47 = vmul.f32 %v135_v45, %v122_v46  ;;  %142 = vrot.lane.b32.xlu2 %v138_v44, %s1617_s9 }
 0x103   :  { %144 = vrot.lane.b32.xlu1 %v139_v47, %s1617_s9 }
 0x15b   :  { %v143_v48 = vpop.permute.xlu2 %142 }
 0x15c   :  { %v148_v50 = vadd.f32 %v143_v48, %v48_v13 }
 0x175   :  { %v145_v49 = vpop.permute.xlu1 %144 }
 0x176   :  { %v149_v51 = vadd.f32 %v145_v49, %v49_v14 }
 0x178   :  { %1476 = vtanh.f32 %v149_v51 }
 0x179   :  { %1478 = vtanh.f32 %v148_v50 }
 0x17e   :  { %v1477_v52 = vpop.eup %1476 }
 0x17f   :  { %v154_v53 = vrot.slane %v1477_v52, 7  ;;  %v1479_v54 = vpop.eup %1478 }
 0x181   :  { %v156_v55 = vsel %vm155_vm10, %v154_v53, %v1479_v54 }
 0x182   :  { %157 = vrot.lane.b32.xlu2 %v156_v55, %s1617_s9 }
 0x1dc   :  { %v158_v56 = vpop.permute.xlu2 %157 }
 0x1dd   :  { %v160_v57 = vsub.f32 %v1687_v4, %v158_v56 }
 0x1df   :  { %v162_v58 = vrot.slane %v160_v57, 1  ;;  %163 = vrot.lane.b32.xlu1 %v160_v57, %s1618_s11 }
 0x1e1   :  { %165 = vrot.lane.b32.xlu0 %v162_v58, %s1618_s11 }
 0x251   :  { %v164_v59 = vpop.permute.xlu1 %163 }
 0x252   :  { %v169_v60 = vmul.f32 %v164_v59, %v107_v42 }
 0x253   :  { %v166_v61 = vpop.permute.xlu0 %165 }
 0x254   :  { %v170_v62 = vmul.f32 %v166_v61, %v122_v46  ;;  %173 = vrot.lane.b32.xlu0 %v169_v60, %s1618_s11 }
 0x256   :  { %175 = vrot.lane.b32.xlu2 %v170_v62, %s1618_s11 }
 0x2b0   :  { %v176_v2 = vpop.permute.xlu2 %175 }
 0x2b1   :  { %v1734_v4 = vadd.f32 %v1477_v52, %v176_v2 }
 0x2b3   :  { %v193_v5 = vpack.c.bf16 %v1734_v4, %v1734_v4 }
 0x2b5   :  { %v200_v8 = vunpack.c.l.b16 %v193_v5 }
 0x2b7   :  { %v201_v11 = vrot.slane %v200_v8, 7 }
 0x2c6   :  { %v174_v7 = vpop.permute.xlu0 %173 }
 0x2c7   :  { %v1738_v9 = vadd.f32 %v1479_v54, %v174_v7 }
 0x2c9   :  { %v192_v10 = vpack.c.bf16 %v1738_v9, %v1738_v9 }
 0x2cb   :  { %v199_v12 = vunpack.c.l.b16 %v192_v10 }
 0x2cd   :  { %v202_v13 = vsel %vm155_vm10, %v201_v11, %v199_v12 }
 0x2ce   :  { %v203_v14 = vpack.c.b16 %v202_v13, %v202_v13 }
 0x2d0   :  { %204 = vrot.lane.b32.xlu1 %v203_v14, %s1617_s9 }
 0x342   :  { %v205_v15 = vpop.permute.xlu1 %204 }
 0x343   :  { %1426 = vmatmul.msk.bf16.vlgmr.msra.gmra.mxu1 %vm63_vm1, %v205_v15  ;;  %1427 = vmatmul.msk.bf16.vlgmr.msra.gmra.mxu2 %vm63_vm1, %v205_v15 }
 0x344   :  { %892 = vmatpush.bf16.msra.mxu2 %v1667_v0  ;;  %869 = vmatpush.bf16.msra.mxu1 %v1719_v63 }
 0x348   :  { %893 = vmatpush.bf16.msra.mxu2 %v1679_v3  ;;  %870 = vmatpush.bf16.msra.mxu1 %v1725_v1 }
 0x3c0   :  { %v230_v17 = vpop.f32.mrf.mxu1 }
 0x3c1   :  { %v231_v18 = vadd.f32 %v1753_v16, %v230_v17 }
 0x3c3   :  { %v234_v19 = vmax.f32 %v231_v18, 0.0 }
 0x3c5   :  { %v236_v20 = vrot.slane %v234_v19, 1  ;;  %239 = vst.msk [vmem:[#allocation5] sm:$0x1] %vm238_vm11, %v234_v19 }
 0x3c6   :  { %v254_v21 = vpop.f32.mrf.mxu2 }
 0x3c7   :  { %240 = vst.msk [vmem:[#allocation5 + $0x8] sm:$0x1] %vm238_vm11, %v236_v20  ;;  %v302_v22 = vadd.f32 %v254_v21, %v1696_v6  ;;  %v259_v28 = vrot.slane %v254_v21, 7  ;;  %v263_v35 = vadd.f32 %v254_v21, %v244_v34 }
 0x3c8   :  { %v232_v23 = vpop.f32.mrf.mxu1 }
 0x3c9   :  { %307 = vrot.lane.b32.xlu0 %v302_v22, %s1617_s9  ;;  %v304_v24 = vrot.slane %v302_v22, 7  ;;  %v262_v29 = vadd.f32 %v259_v28, %v243_v27  ;;  %v1429_v36 = vmul.f32 -1.442695, %v263_v35 }
 0x3cb   :  { %305 = vrot.lane.b32.xlu2 %v304_v24, %s1617_s9  ;;  %v1428_v30 = vmul.f32 -1.442695, %v262_v29 }
 0x3cd   :  { %1480 = vpow2.f32 %v1428_v30 }
 0x3ce   :  { %v256_v25 = vpop.f32.mrf.mxu2 }
 0x3d3   :  { %v1481_v31 = vpop.eup %1480 }
 0x3d4   :  { %v270_v33 = vadd.f32 1.0, %v1481_v31 }
 0x3d6   :  { %1482 = vrcp.f32 %v270_v33  ;;  %v283_v44 = vand.u32 2147483648, %v270_v33  ;;  %vm277_vm13 = vweird.f32 %v270_v33  ;;  %v281_v45 = vand.u32 2147483647, %v270_v33 }
 0x3d7   :  { %1484 = vpow2.f32 %v1429_v36 }
 0x3d8   :  { %v284_v47 = vor.u32 1.1754944e-38, %v283_v44  ;;  %vm282_vm15 = vcmp.eq.f32.partialorder %v281_v45, 8.507059e+37  ;;  %v399_v45 = vld [vmem:[%s2041_s0] sm:$0x2] }
 0x3dc   :  { %v1483_v37 = vpop.eup %1482 }
 0x3dd   :  { %v273_v38 = vmul.f32 %v1483_v37, %v270_v33  ;;  %v1485_v40 = vpop.eup %1484  ;;  %vm278_vm12 = vweird.f32 %v1483_v37 }
 0x3de   :  { %v271_v42 = vadd.f32 1.0, %v1485_v40  ;;  %vm279_vm14 = vmor %vm277_vm13, %vm278_vm12 }
 0x3df   :  { %v274_v39 = vsub.f32 1.0, %v273_v38 }
 0x3e0   :  { %1486 = vrcp.f32 %v271_v42  ;;  %v298_v56 = vand.u32 2147483648, %v271_v42  ;;  %vm292_vm2 = vweird.f32 %v271_v42  ;;  %v296_v57 = vand.u32 2147483647, %v271_v42 }
 0x3e1   :  { %v275_v41 = vmul.f32 %v1483_v37, %v274_v39 }
 0x3e2   :  { %v299_v59 = vor.u32 1.1754944e-38, %v298_v56  ;;  %vm297_vm4 = vcmp.eq.f32.partialorder %v296_v57, 8.507059e+37 }
 0x3e3   :  { %v276_v43 = vadd.f32 %v1483_v37, %v275_v41 }
 0x3e5   :  { %v280_v46 = vsel %vm279_vm14, %v1483_v37, %v276_v43 }
 0x3e6   :  { %v1487_v48 = vpop.eup %1486  ;;  %v285_v50 = vsel %vm282_vm15, %v284_v47, %v280_v46  ;;  %v401_v46 = vunpack.c.l.bf16 %v399_v45 }
 0x3e7   :  { %v288_v52 = vmul.f32 %v1487_v48, %v271_v42  ;;  %vm293_vm0 = vweird.f32 %v1487_v48 }
 0x3e8   :  { %vm294_vm3 = vmor %vm292_vm2, %vm293_vm0 }
 0x3e9   :  { %v289_v53 = vsub.f32 1.0, %v288_v52 }
 0x3eb   :  { %v290_v54 = vmul.f32 %v1487_v48, %v289_v53 }
 0x3ed   :  { %v291_v55 = vadd.f32 %v1487_v48, %v290_v54 }
 0x3ef   :  { %v295_v58 = vsel %vm294_vm3, %v1487_v48, %v291_v55 }
 0x3f0   :  { %v300_v61 = vsel %vm297_vm4, %v299_v59, %v295_v58 }
 0x425   :  { %v306_v49 = vpop.permute.xlu2 %305 }
 0x426   :  { %v311_v51 = vmul.f32 %v306_v49, %v285_v50 }
 0x428   :  { %315 = vrot.lane.b32.xlu1 %v311_v51, %s1617_s9  ;;  %v400_v51 = vld [vmem:[%s2041_s0 + $0x4] sm:$0x2] }
 0x429   :  { %v402_v53 = vunpack.c.l.bf16 %v400_v51 }
 0x43b   :  { %v308_v60 = vpop.permute.xlu0 %307 }
 0x43c   :  { %v312_v62 = vmul.f32 %v308_v60, %v300_v61 }
 0x43e   :  { %317 = vrot.lane.b32.xlu2 %v312_v62, %s1617_s9 }
 0x498   :  { %v318_v2 = vpop.permute.xlu2 %317 }
 0x499   :  { %v322_v5 = vadd.f32 %v318_v2, %v244_v34 }
 0x49a   :  { %v316_v7 = vpop.permute.xlu1 %315 }
 0x49b   :  { %1488 = vtanh.f32 %v322_v5  ;;  %v321_v8 = vadd.f32 %v316_v7, %v243_v27 }
 0x49d   :  { %1490 = vtanh.f32 %v321_v8 }
 0x4a1   :  { %v1489_v10 = vpop.eup %1488 }
 0x4a2   :  { %v328_v11 = vrot.slane %v1489_v10, 1 }
 0x4a3   :  { %v1491_v12 = vpop.eup %1490 }
 0x4a4   :  { %v332_v13 = vsub.f32 %v1734_v4, %v328_v11  ;;  %v327_v14 = vrot.slane %v1491_v12, 1 }
 0x4a6   :  { %v336_v15 = vrot.slane %v332_v13, 7  ;;  %v331_v17 = vsub.f32 %v1738_v9, %v327_v14 }
 0x4a8   :  { %339 = vrot.lane.b32.xlu1 %v336_v15, %s1619_s21  ;;  %v335_v18 = vrot.slane %v331_v17, 7 }
 0x4aa   :  { %337 = vrot.lane.b32.xlu0 %v335_v18, %s1619_s21 }
 0x51a   :  { %v340_v19 = vpop.permute.xlu1 %339 }
 0x51b   :  { %v344_v20 = vmul.f32 %v340_v19, %v300_v61 }
 0x51c   :  { %v338_v21 = vpop.permute.xlu0 %337 }
 0x51d   :  { %v343_v22 = vmul.f32 %v338_v21, %v285_v50  ;;  %349 = vrot.lane.b32.xlu0 %v344_v20, %s1618_s11 }
 0x51f   :  { %347 = vrot.lane.b32.xlu2 %v343_v22, %s1618_s11 }
 0x579   :  { %v348_v23 = vpop.permute.xlu2 %347 }
 0x57a   :  { %v1775_v24 = vadd.f32 %v1491_v12, %v348_v23 }
 0x57c   :  { %v366_v25 = vpack.c.bf16 %v1775_v24, %v1775_v24 }
 0x57e   :  { %v370_v27 = vunpack.c.l.b16 %v366_v25 }
 0x580   :  { %v372_v30 = vrot.slane %v370_v27, 1 }
 0x58f   :  { %v350_v26 = vpop.permute.xlu0 %349 }
 0x590   :  { %v1779_v28 = vadd.f32 %v1489_v10, %v350_v26 }
 0x592   :  { %v367_v29 = vpack.c.bf16 %v1779_v28, %v1779_v28 }
 0x594   :  { %v371_v31 = vunpack.c.l.b16 %v367_v29 }
 0x596   :  { %v373_v32 = vsel %vm155_vm10, %v371_v31, %v372_v30 }
 0x597   :  { %v374_v33 = vpack.c.b16 %v373_v32, %v373_v32 }
 0x599   :  { %375 = vrot.lane.b32.xlu1 %v374_v33, %s1617_s9 }
 0x60b   :  { %v376_v34 = vpop.permute.xlu1 %375 }
 0x60c   :  { %1430 = vmatmul.msk.bf16.vlgmr.msra.gmra.mxu3 %vm63_vm1, %v376_v34  ;;  %1431 = vmatmul.msk.bf16.vlgmr.msrb.gmra.mxu0 %vm63_vm1, %v376_v34 }
 0x60d   :  { %1053 = vmatpush.bf16.msrb.mxu0 %v1667_v0  ;;  %1030 = vmatpush.bf16.msra.mxu3 %v1719_v63 }
 0x611   :  { %1054 = vmatpush.bf16.msrb.mxu0 %v1679_v3  ;;  %1031 = vmatpush.bf16.msra.mxu3 %v1725_v1 }
 0x689   :  { %v412_v35 = vpop.f32.mrf.mxu0 }
 0x68a   :  { %v461_v36 = vadd.f32 %v412_v35, %v1696_v6  ;;  %v417_v47 = vrot.slane %v412_v35, 6  ;;  %v418_v54 = vrot.slane %v412_v35, 7 }
 0x68c   :  { %v464_v37 = vrot.slane %v461_v36, 7  ;;  %v463_v38 = vrot.slane %v461_v36, 6  ;;  %v421_v48 = vadd.f32 %v417_v47, %v401_v46  ;;  %v422_v55 = vadd.f32 %v418_v54, %v402_v53 }
 0x68e   :  { %467 = vrot.lane.b32.xlu0 %v464_v37, %s1617_s9  ;;  %465 = vrot.lane.b32.xlu2 %v463_v38, %s1617_s9  ;;  %v1432_v49 = vmul.f32 -1.442695, %v421_v48  ;;  %v1433_v57 = vmul.f32 -1.442695, %v422_v55 }
 0x68f   :  { %v389_v39 = vpop.f32.mrf.mxu3 }
 0x690   :  { %v390_v40 = vadd.f32 %v1753_v16, %v389_v39  ;;  %1492 = vpow2.f32 %v1432_v49 }
 0x691   :  { %v414_v41 = vpop.f32.mrf.mxu0 }
 0x692   :  { %v393_v42 = vmax.f32 %v390_v40, 0.0 }
 0x694   :  { %v395_v43 = vrot.slane %v393_v42, 1  ;;  %397 = vst.msk [vmem:[#allocation5 + $0x1] sm:$0x1] %vm238_vm11, %v393_v42 }
 0x696   :  { %398 = vst.msk [vmem:[#allocation5 + $0x9] sm:$0x1] %vm238_vm11, %v395_v43  ;;  %v1493_v50 = vpop.eup %1492 }
 0x697   :  { %v391_v44 = vpop.f32.mrf.mxu3  ;;  %v429_v52 = vadd.f32 1.0, %v1493_v50 }
 0x699   :  { %1494 = vrcp.f32 %v429_v52  ;;  %v442_v5 = vand.u32 2147483648, %v429_v52  ;;  %vm436_vm6 = vweird.f32 %v429_v52  ;;  %v440_v7 = vand.u32 2147483647, %v429_v52 }
 0x69a   :  { %1496 = vpow2.f32 %v1433_v57 }
 0x69b   :  { %v443_v10 = vor.u32 1.1754944e-38, %v442_v5  ;;  %vm441_vm8 = vcmp.eq.f32.partialorder %v440_v7, 8.507059e+37 }
 0x69f   :  { %v1495_v56 = vpop.eup %1494 }
 0x6a0   :  { %v432_v58 = vmul.f32 %v1495_v56, %v429_v52  ;;  %v1497_v60 = vpop.eup %1496  ;;  %vm437_vm5 = vweird.f32 %v1495_v56 }
 0x6a1   :  { %v430_v62 = vadd.f32 1.0, %v1497_v60  ;;  %vm438_vm7 = vmor %vm436_vm6, %vm437_vm5 }
 0x6a2   :  { %v433_v59 = vsub.f32 1.0, %v432_v58 }
 0x6a3   :  { %1498 = vrcp.f32 %v430_v62  ;;  %v457_v20 = vand.u32 2147483648, %v430_v62  ;;  %vm451_vm12 = vweird.f32 %v430_v62  ;;  %v455_v21 = vand.u32 2147483647, %v430_v62 }
 0x6a4   :  { %v434_v61 = vmul.f32 %v1495_v56, %v433_v59 }
 0x6a5   :  { %v458_v23 = vor.u32 1.1754944e-38, %v457_v20  ;;  %vm456_vm14 = vcmp.eq.f32.partialorder %v455_v21, 8.507059e+37 }
 0x6a6   :  { %v435_v2 = vadd.f32 %v1495_v56, %v434_v61 }
 0x6a8   :  { %v439_v8 = vsel %vm438_vm7, %v1495_v56, %v435_v2 }
 0x6a9   :  { %v444_v12 = vsel %vm441_vm8, %v443_v10, %v439_v8  ;;  %v1499_v14 = vpop.eup %1498  ;;  %v560_v8 = vld [vmem:[%s2041_s0] sm:$0x2] }
 0x6aa   :  { %v447_v15 = vmul.f32 %v1499_v14, %v430_v62  ;;  %vm452_vm9 = vweird.f32 %v1499_v14  ;;  %v562_v10 = vunpack.c.l.bf16 %v560_v8 }
 0x6ab   :  { %vm453_vm13 = vmor %vm451_vm12, %vm452_vm9 }
 0x6ac   :  { %v448_v17 = vsub.f32 1.0, %v447_v15  ;;  %v561_v15 = vld [vmem:[%s2041_s0 + $0x4] sm:$0x2] }
 0x6ae   :  { %v449_v18 = vmul.f32 %v1499_v14, %v448_v17 }
 0x6b0   :  { %v450_v19 = vadd.f32 %v1499_v14, %v449_v18  ;;  %v563_v18 = vunpack.c.l.bf16 %v561_v15 }
 0x6b2   :  { %v454_v22 = vsel %vm453_vm13, %v1499_v14, %v450_v19 }
 0x6b3   :  { %v459_v26 = vsel %vm456_vm14, %v458_v23, %v454_v22 }
 0x6e8   :  { %v466_v11 = vpop.permute.xlu2 %465 }
 0x6e9   :  { %v471_v13 = vmul.f32 %v466_v11, %v444_v12 }
 0x6eb   :  { %475 = vrot.lane.b32.xlu1 %v471_v13, %s1617_s9 }
 0x700   :  { %v468_v25 = vpop.permute.xlu0 %467 }
 0x701   :  { %v472_v27 = vmul.f32 %v468_v25, %v459_v26 }
 0x703   :  { %477 = vrot.lane.b32.xlu2 %v472_v27, %s1617_s9 }
 0x75d   :  { %v478_v29 = vpop.permute.xlu2 %477  ;;  %v476_v30 = vpop.permute.xlu1 %475 }
 0x75e   :  { %v482_v31 = vadd.f32 %v478_v29, %v402_v53  ;;  %v481_v32 = vadd.f32 %v476_v30, %v401_v46 }
 0x760   :  { %1500 = vtanh.f32 %v482_v31 }
 0x761   :  { %1502 = vtanh.f32 %v481_v32 }
 0x766   :  { %v1501_v33 = vpop.eup %1500 }
 0x767   :  { %v1503_v34 = vpop.eup %1502  ;;  %v488_v35 = vrot.slane %v1501_v33, 1 }
 0x768   :  { %v487_v36 = vrot.slane %v1503_v34, 1 }
 0x769   :  { %v492_v37 = vsub.f32 %v1779_v28, %v488_v35 }
 0x76a   :  { %v491_v38 = vsub.f32 %v1775_v24, %v487_v36 }
 0x76b   :  { %v496_v39 = vrot.slane %v492_v37, 7 }
 0x76c   :  { %v495_v40 = vrot.slane %v491_v38, 7 }
 0x76d   :  { %499 = vrot.lane.b32.xlu1 %v496_v39, %s1619_s21 }
 0x76e   :  { %497 = vrot.lane.b32.xlu0 %v495_v40, %s1619_s21 }
 0x7df   :  { %v500_v41 = vpop.permute.xlu1 %499 }
 0x7e0   :  { %v498_v42 = vpop.permute.xlu0 %497  ;;  %v504_v43 = vmul.f32 %v500_v41, %v459_v26 }
 0x7e1   :  { %v503_v44 = vmul.f32 %v498_v42, %v444_v12 }
 0x7e2   :  { %509 = vrot.lane.b32.xlu0 %v504_v43, %s1618_s11 }
 0x7e3   :  { %507 = vrot.lane.b32.xlu2 %v503_v44, %s1618_s11 }
 0x83d   :  { %v508_v45 = vpop.permute.xlu2 %507 }
 0x83e   :  { %v1811_v46 = vadd.f32 %v1503_v34, %v508_v45 }
 0x840   :  { %v526_v47 = vpack.c.bf16 %v1811_v46, %v1811_v46 }
 0x842   :  { %v530_v50 = vunpack.c.l.b16 %v526_v47 }
 0x844   :  { %v532_v53 = vrot.slane %v530_v50, 2 }
 0x854   :  { %v510_v48 = vpop.permute.xlu0 %509 }
 0x855   :  { %v1815_v49 = vadd.f32 %v1501_v33, %v510_v48 }
 0x857   :  { %v527_v51 = vpack.c.bf16 %v1815_v49, %v1815_v49 }
 0x859   :  { %v531_v52 = vunpack.c.l.b16 %v527_v51 }
 0x85b   :  { %v533_v54 = vrot.slane %v531_v52, 1 }
 0x85d   :  { %v534_v55 = vsel %vm155_vm10, %v533_v54, %v532_v53 }
 0x85e   :  { %v535_v56 = vpack.c.b16 %v534_v55, %v534_v55 }
 0x860   :  { %536 = vrot.lane.b32.xlu1 %v535_v56, %s1617_s9 }
 0x8d2   :  { %v537_v57 = vpop.permute.xlu1 %536 }
 0x8d3   :  { %1434 = vmatmul.msk.bf16.vlgmr.msrb.gmra.mxu1 %vm63_vm1, %v537_v57  ;;  %1435 = vmatmul.msk.bf16.vlgmr.msrb.gmra.mxu2 %vm63_vm1, %v537_v57 }
 0x8d4   :  { %1214 = vmatpush.bf16.msrb.mxu2 %v1667_v0  ;;  %1191 = vmatpush.bf16.msrb.mxu1 %v1719_v63 }
 0x8d8   :  { %1215 = vmatpush.bf16.msrb.mxu2 %v1679_v3  ;;  %1192 = vmatpush.bf16.msrb.mxu1 %v1725_v1 }
 0x950   :  { %v550_v58 = vpop.f32.mrf.mxu1 }
 0x951   :  { %v551_v59 = vadd.f32 %v1753_v16, %v550_v58 }
 0x953   :  { %v554_v60 = vmax.f32 %v551_v59, 0.0 }
 0x955   :  { %v556_v61 = vrot.slane %v554_v60, 1  ;;  %558 = vst.msk [vmem:[#allocation5 + $0x2] sm:$0x1] %vm238_vm11, %v554_v60 }
 0x956   :  { %v573_v62 = vpop.f32.mrf.mxu2 }
 0x957   :  { %559 = vst.msk [vmem:[#allocation5 + $0xa] sm:$0x1] %vm238_vm11, %v556_v61  ;;  %v622_v2 = vadd.f32 %v573_v62, %v1696_v6  ;;  %v578_v11 = vrot.slane %v573_v62, 5  ;;  %v579_v19 = vrot.slane %v573_v62, 6 }
 0x958   :  { %v552_v5 = vpop.f32.mrf.mxu1 }
 0x959   :  { %v625_v0 = vrot.slane %v622_v2, 6  ;;  %v624_v7 = vrot.slane %v622_v2, 5  ;;  %v582_v12 = vadd.f32 %v578_v11, %v562_v10  ;;  %v583_v20 = vadd.f32 %v579_v19, %v563_v18 }
 0x95b   :  { %628 = vrot.lane.b32.xlu0 %v625_v0, %s1617_s9  ;;  %626 = vrot.lane.b32.xlu2 %v624_v7, %s1617_s9  ;;  %v1436_v13 = vmul.f32 -1.442695, %v582_v12  ;;  %v1437_v22 = vmul.f32 -1.442695, %v583_v20 }
 0x95d   :  { %1504 = vpow2.f32 %v1436_v13 }
 0x95e   :  { %v575_v3 = vpop.f32.mrf.mxu2 }
 0x963   :  { %v1505_v14 = vpop.eup %1504 }
 0x964   :  { %v590_v17 = vadd.f32 1.0, %v1505_v14 }
 0x966   :  { %1506 = vrcp.f32 %v590_v17  ;;  %v603_v31 = vand.u32 2147483648, %v590_v17  ;;  %vm597_vm0 = vweird.f32 %v590_v17  ;;  %v601_v32 = vand.u32 2147483647, %v590_v17 }
 0x967   :  { %1508 = vpow2.f32 %v1437_v22 }
 0x968   :  { %v604_v34 = vor.u32 1.1754944e-38, %v603_v31  ;;  %vm602_vm3 = vcmp.eq.f32.partialorder %v601_v32, 8.507059e+37 }
 0x96c   :  { %v1507_v21 = vpop.eup %1506 }
 0x96d   :  { %v593_v23 = vmul.f32 %v1507_v21, %v590_v17  ;;  %v1509_v26 = vpop.eup %1508  ;;  %vm598_vm15 = vweird.f32 %v1507_v21 }
 0x96e   :  { %v591_v29 = vadd.f32 1.0, %v1509_v26  ;;  %vm599_vm2 = vmor %vm597_vm0, %vm598_vm15 }
 0x96f   :  { %v594_v25 = vsub.f32 1.0, %v593_v23 }
 0x970   :  { %1510 = vrcp.f32 %v591_v29  ;;  %v618_v43 = vand.u32 2147483648, %v591_v29  ;;  %vm612_vm5 = vweird.f32 %v591_v29  ;;  %v616_v44 = vand.u32 2147483647, %v591_v29 }
 0x971   :  { %v595_v27 = vmul.f32 %v1507_v21, %v594_v25 }
 0x972   :  { %v619_v47 = vor.u32 1.1754944e-38, %v618_v43  ;;  %vm617_vm7 = vcmp.eq.f32.partialorder %v616_v44, 8.507059e+37 }
 0x973   :  { %v596_v30 = vadd.f32 %v1507_v21, %v595_v27 }
 0x975   :  { %v600_v33 = vsel %vm599_vm2, %v1507_v21, %v596_v30 }
 0x976   :  { %v605_v36 = vsel %vm602_vm3, %v604_v34, %v600_v33  ;;  %v1511_v38 = vpop.eup %1510 }
 0x977   :  { %v608_v39 = vmul.f32 %v1511_v38, %v591_v29  ;;  %vm613_vm4 = vweird.f32 %v1511_v38 }
 0x978   :  { %vm614_vm6 = vmor %vm612_vm5, %vm613_vm4 }
 0x979   :  { %v609_v40 = vsub.f32 1.0, %v608_v39  ;;  %v722_v39 = vld [vmem:[%s2041_s0 + $0x4] sm:$0x4] }
 0x97b   :  { %v610_v41 = vmul.f32 %v1511_v38, %v609_v40 }
 0x97d   :  { %v611_v42 = vadd.f32 %v1511_v38, %v610_v41  ;;  %v724_v41 = vunpack.c.l.bf16 %v722_v39 }
 0x97f   :  { %v615_v45 = vsel %vm614_vm6, %v1511_v38, %v611_v42 }
 0x980   :  { %v620_v50 = vsel %vm617_vm7, %v619_v47, %v615_v45 }
 0x9b5   :  { %v627_v35 = vpop.permute.xlu2 %626 }
 0x9b6   :  { %v632_v37 = vmul.f32 %v627_v35, %v605_v36 }
 0x9b8   :  { %636 = vrot.lane.b32.xlu1 %v632_v37, %s1617_s9 }
 0x9cd   :  { %v629_v48 = vpop.permute.xlu0 %628 }
 0x9ce   :  { %v633_v51 = vmul.f32 %v629_v48, %v620_v50 }
 0x9d0   :  { %638 = vrot.lane.b32.xlu2 %v633_v51, %s1617_s9 }
 0xa2a   :  { %v639_v52 = vpop.permute.xlu2 %638  ;;  %v637_v53 = vpop.permute.xlu1 %636 }
 0xa2b   :  { %v643_v54 = vadd.f32 %v639_v52, %v563_v18  ;;  %v642_v55 = vadd.f32 %v637_v53, %v562_v10 }
 0xa2d   :  { %1512 = vtanh.f32 %v643_v54 }
 0xa2e   :  { %1514 = vtanh.f32 %v642_v55 }
 0xa33   :  { %v1513_v56 = vpop.eup %1512 }
 0xa34   :  { %v1515_v57 = vpop.eup %1514  ;;  %v649_v58 = vrot.slane %v1513_v56, 1 }
 0xa35   :  { %v648_v59 = vrot.slane %v1515_v57, 1 }
 0xa36   :  { %v653_v60 = vsub.f32 %v1815_v49, %v649_v58 }
 0xa37   :  { %v652_v61 = vsub.f32 %v1811_v46, %v648_v59 }
 0xa38   :  { %v657_v62 = vrot.slane %v653_v60, 7 }
 0xa39   :  { %v656_v2 = vrot.slane %v652_v61, 7 }
 0xa3a   :  { %660 = vrot.lane.b32.xlu1 %v657_v62, %s1619_s21 }
 0xa3b   :  { %658 = vrot.lane.b32.xlu0 %v656_v2, %s1619_s21 }
 0xaac   :  { %v661_v5 = vpop.permute.xlu1 %660 }
 0xaad   :  { %v659_v0 = vpop.permute.xlu0 %658  ;;  %v665_v7 = vmul.f32 %v661_v5, %v620_v50 }
 0xaae   :  { %v664_v3 = vmul.f32 %v659_v0, %v605_v36 }
 0xaaf   :  { %670 = vrot.lane.b32.xlu0 %v665_v7, %s1618_s11 }
 0xab0   :  { %668 = vrot.lane.b32.xlu2 %v664_v3, %s1618_s11 }
 0xb0a   :  { %v669_v8 = vpop.permute.xlu2 %668 }
 0xb0b   :  { %v1847_v10 = vadd.f32 %v1515_v57, %v669_v8 }
 0xb0d   :  { %v687_v11 = vpack.c.bf16 %v1847_v10, %v1847_v10 }
 0xb0f   :  { %v691_v14 = vunpack.c.l.b16 %v687_v11 }
 0xb11   :  { %v693_v18 = vrot.slane %v691_v14, 3 }
 0xb21   :  { %v671_v12 = vpop.permute.xlu0 %670 }
 0xb22   :  { %v1851_v13 = vadd.f32 %v1513_v56, %v671_v12 }
 0xb24   :  { %v688_v15 = vpack.c.bf16 %v1851_v13, %v1851_v13 }
 0xb26   :  { %v692_v17 = vunpack.c.l.b16 %v688_v15 }
 0xb28   :  { %v694_v19 = vrot.slane %v692_v17, 2 }
 0xb2a   :  { %v695_v20 = vsel %vm155_vm10, %v694_v19, %v693_v18 }
 0xb2b   :  { %v696_v21 = vpack.c.b16 %v695_v20, %v695_v20 }
 0xb2d   :  { %697 = vrot.lane.b32.xlu1 %v696_v21, %s1617_s9 }
 0xb9f   :  { %v698_v22 = vpop.permute.xlu1 %697 }
 0xba0   :  { %1438 = vmatmul.msk.bf16.vlgmr.msrb.gmra.mxu3 %vm63_vm1, %v698_v22  ;;  %1439 = vmatmul.msk.bf16.vlgmr.msra.gmra.mxu0 %vm63_vm1, %v698_v22 }
 0xba1   :  { %1352 = vmatpush.bf16.msrb.mxu3 %v1719_v63 }
 0xba5   :  { %1353 = vmatpush.bf16.msrb.mxu3 %v1725_v1  ;;  %v721_v1 = vld [vmem:[%s2041_s0] sm:$0x4] }
 0xba6   :  { %v723_v34 = vunpack.c.l.bf16 %v721_v1 }
 0xc1d   :  { %v734_v23 = vpop.f32.mrf.mxu0 }
 0xc1e   :  { %v783_v25 = vadd.f32 %v734_v23, %v1696_v6  ;;  %v739_v35 = vrot.slane %v734_v23, 4  ;;  %v740_v42 = vrot.slane %v734_v23, 5 }
 0xc20   :  { %v786_v26 = vrot.slane %v783_v25, 5  ;;  %v785_v27 = vrot.slane %v783_v25, 4  ;;  %v743_v36 = vadd.f32 %v739_v35, %v723_v34  ;;  %v744_v43 = vadd.f32 %v740_v42, %v724_v41 }
 0xc22   :  { %789 = vrot.lane.b32.xlu0 %v786_v26, %s1617_s9  ;;  %787 = vrot.lane.b32.xlu2 %v785_v27, %s1617_s9  ;;  %v1440_v37 = vmul.f32 -1.442695, %v743_v36  ;;  %v1441_v45 = vmul.f32 -1.442695, %v744_v43 }
 0xc23   :  { %v711_v29 = vpop.f32.mrf.mxu3 }
 0xc24   :  { %v712_v30 = vadd.f32 %v1753_v16, %v711_v29  ;;  %1516 = vpow2.f32 %v1440_v37 }
 0xc25   :  { %v736_v31 = vpop.f32.mrf.mxu0 }
 0xc26   :  { %v715_v32 = vmax.f32 %v712_v30, 0.0 }
 0xc28   :  { %v717_v33 = vrot.slane %v715_v32, 1  ;;  %719 = vst.msk [vmem:[#allocation5 + $0x3] sm:$0x1] %vm238_vm11, %v715_v32 }
 0xc2a   :  { %720 = vst.msk [vmem:[#allocation5 + $0xb] sm:$0x1] %vm238_vm11, %v717_v33  ;;  %v1517_v38 = vpop.eup %1516 }
 0xc2b   :  { %v713_v63 = vpop.f32.mrf.mxu3  ;;  %v751_v40 = vadd.f32 1.0, %v1517_v38 }
 0xc2d   :  { %1518 = vrcp.f32 %v751_v40  ;;  %v764_v54 = vand.u32 2147483648, %v751_v40  ;;  %vm758_vm9 = vweird.f32 %v751_v40  ;;  %v762_v55 = vand.u32 2147483647, %v751_v40 }
 0xc2e   :  { %1520 = vpow2.f32 %v1441_v45 }
 0xc2f   :  { %v765_v57 = vor.u32 1.1754944e-38, %v764_v54  ;;  %vm763_vm13 = vcmp.eq.f32.partialorder %v762_v55, 8.507059e+37 }
 0xc33   :  { %v1519_v44 = vpop.eup %1518 }
 0xc34   :  { %v754_v47 = vmul.f32 %v1519_v44, %v751_v40  ;;  %v1521_v50 = vpop.eup %1520  ;;  %vm759_vm8 = vweird.f32 %v1519_v44 }
 0xc35   :  { %v752_v52 = vadd.f32 1.0, %v1521_v50  ;;  %vm760_vm12 = vmor %vm758_vm9, %vm759_vm8 }
 0xc36   :  { %v755_v48 = vsub.f32 1.0, %v754_v47 }
 0xc37   :  { %1522 = vrcp.f32 %v752_v52  ;;  %v779_v7 = vand.u32 2147483648, %v752_v52  ;;  %vm773_vm15 = vweird.f32 %v752_v52  ;;  %v777_v3 = vand.u32 2147483647, %v752_v52 }
 0xc38   :  { %v756_v51 = vmul.f32 %v1519_v44, %v755_v48 }
 0xc39   :  { %v780_v11 = vor.u32 1.1754944e-38, %v779_v7  ;;  %vm778_vm2 = vcmp.eq.f32.partialorder %v777_v3, 8.507059e+37 }
 0xc3a   :  { %v757_v53 = vadd.f32 %v1519_v44, %v756_v51 }
 0xc3c   :  { %v761_v56 = vsel %vm760_vm12, %v1519_v44, %v757_v53 }
 0xc3d   :  { %v766_v59 = vsel %vm763_vm13, %v765_v57, %v761_v56  ;;  %v1523_v61 = vpop.eup %1522 }
 0xc3e   :  { %v769_v62 = vmul.f32 %v1523_v61, %v752_v52  ;;  %vm774_vm14 = vweird.f32 %v1523_v61 }
 0xc3f   :  { %vm775_vm0 = vmor %vm773_vm15, %vm774_vm14 }
 0xc40   :  { %v770_v2 = vsub.f32 1.0, %v769_v62 }
 0xc42   :  { %v771_v5 = vmul.f32 %v1523_v61, %v770_v2  ;;  %v883_v2 = vld [vmem:[%s2041_s0 + $0x4] sm:$0x4] }
 0xc44   :  { %v772_v0 = vadd.f32 %v1523_v61, %v771_v5 }
 0xc46   :  { %v776_v8 = vsel %vm775_vm0, %v1523_v61, %v772_v0  ;;  %v885_v0 = vunpack.c.l.bf16 %v883_v2 }
 0xc47   :  { %v781_v14 = vsel %vm778_vm2, %v780_v11, %v776_v8 }
 0xc7c   :  { %v788_v58 = vpop.permute.xlu2 %787 }
 0xc7d   :  { %v793_v60 = vmul.f32 %v788_v58, %v766_v59 }
 0xc7f   :  { %797 = vrot.lane.b32.xlu1 %v793_v60, %s1617_s9 }
 0xc94   :  { %v790_v12 = vpop.permute.xlu0 %789 }
 0xc95   :  { %v794_v15 = vmul.f32 %v790_v12, %v781_v14 }
 0xc97   :  { %799 = vrot.lane.b32.xlu2 %v794_v15, %s1617_s9 }
 0xcf1   :  { %v800_v17 = vpop.permute.xlu2 %799  ;;  %v798_v18 = vpop.permute.xlu1 %797 }
 0xcf2   :  { %v804_v19 = vadd.f32 %v800_v17, %v724_v41  ;;  %v803_v20 = vadd.f32 %v798_v18, %v723_v34 }
 0xcf4   :  { %1524 = vtanh.f32 %v804_v19 }
 0xcf5   :  { %1526 = vtanh.f32 %v803_v20 }
 0xcfa   :  { %v1525_v21 = vpop.eup %1524 }
 0xcfb   :  { %v1527_v22 = vpop.eup %1526  ;;  %v810_v23 = vrot.slane %v1525_v21, 1 }
 0xcfc   :  { %v809_v25 = vrot.slane %v1527_v22, 1 }
 0xcfd   :  { %v814_v26 = vsub.f32 %v1851_v13, %v810_v23 }
 0xcfe   :  { %v813_v27 = vsub.f32 %v1847_v10, %v809_v25 }
 0xcff   :  { %v818_v29 = vrot.slane %v814_v26, 7 }
 0xd00   :  { %v817_v30 = vrot.slane %v813_v27, 7 }
 0xd01   :  { %821 = vrot.lane.b32.xlu1 %v818_v29, %s1619_s21 }
 0xd02   :  { %819 = vrot.lane.b32.xlu0 %v817_v30, %s1619_s21 }
 0xd73   :  { %v822_v31 = vpop.permute.xlu1 %821 }
 0xd74   :  { %v820_v32 = vpop.permute.xlu0 %819  ;;  %v826_v33 = vmul.f32 %v822_v31, %v781_v14 }
 0xd75   :  { %v825_v63 = vmul.f32 %v820_v32, %v766_v59 }
 0xd76   :  { %831 = vrot.lane.b32.xlu0 %v826_v33, %s1618_s11 }
 0xd77   :  { %829 = vrot.lane.b32.xlu2 %v825_v63, %s1618_s11 }
 0xdd1   :  { %v830_v1 = vpop.permute.xlu2 %829 }
 0xdd2   :  { %v1881_v34 = vadd.f32 %v1527_v22, %v830_v1 }
 0xdd4   :  { %v848_v35 = vpack.c.bf16 %v1881_v34, %v1881_v34 }
 0xdd6   :  { %v852_v38 = vunpack.c.l.b16 %v848_v35 }
 0xdd8   :  { %v854_v41 = vrot.slane %v852_v38, 4 }
 0xde8   :  { %v832_v36 = vpop.permute.xlu0 %831 }
 0xde9   :  { %v1885_v37 = vadd.f32 %v1525_v21, %v832_v36 }
 0xdeb   :  { %v849_v39 = vpack.c.bf16 %v1885_v37, %v1885_v37 }
 0xded   :  { %v853_v40 = vunpack.c.l.b16 %v849_v39 }
 0xdef   :  { %v855_v42 = vrot.slane %v853_v40, 3 }
 0xdf1   :  { %v856_v43 = vsel %vm155_vm10, %v855_v42, %v854_v41 }
 0xdf2   :  { %v857_v44 = vpack.c.b16 %v856_v43, %v856_v43 }
 0xdf4   :  { %858 = vrot.lane.b32.xlu1 %v857_v44, %s1617_s9 }
 0xe66   :  { %v859_v45 = vpop.permute.xlu1 %858 }
 0xe67   :  { %1442 = vmatmul.msk.bf16.vlgmr.msra.gmra.mxu1 %vm63_vm1, %v859_v45  ;;  %1443 = vmatmul.msk.bf16.vlgmr.msra.gmra.mxu2 %vm63_vm1, %v859_v45 }
 0xee4   :  { %v872_v47 = vpop.f32.mrf.mxu1 }
 0xee5   :  { %v873_v48 = vadd.f32 %v1753_v16, %v872_v47  ;;  %v882_v16 = vld [vmem:[%s2041_s0] sm:$0x4] }
 0xee6   :  { %v884_v58 = vunpack.c.l.bf16 %v882_v16 }
 0xee7   :  { %v876_v50 = vmax.f32 %v873_v48, 0.0 }
 0xee9   :  { %v878_v51 = vrot.slane %v876_v50, 1  ;;  %880 = vst.msk [vmem:[#allocation5 + $0x4] sm:$0x1] %vm238_vm11, %v876_v50 }
 0xeea   :  { %v895_v52 = vpop.f32.mrf.mxu2 }
 0xeeb   :  { %881 = vst.msk [vmem:[#allocation5 + $0xc] sm:$0x1] %vm238_vm11, %v878_v51  ;;  %v944_v53 = vadd.f32 %v895_v52, %v1696_v6  ;;  %v900_v59 = vrot.slane %v895_v52, 3  ;;  %v901_v7 = vrot.slane %v895_v52, 4 }
 0xeec   :  { %v874_v54 = vpop.f32.mrf.mxu1 }
 0xeed   :  { %v947_v55 = vrot.slane %v944_v53, 4  ;;  %v946_v56 = vrot.slane %v944_v53, 3  ;;  %v904_v60 = vadd.f32 %v900_v59, %v884_v58  ;;  %v905_v3 = vadd.f32 %v901_v7, %v885_v0 }
 0xeef   :  { %950 = vrot.lane.b32.xlu0 %v947_v55, %s1617_s9  ;;  %948 = vrot.lane.b32.xlu2 %v946_v56, %s1617_s9  ;;  %v1444_v61 = vmul.f32 -1.442695, %v904_v60  ;;  %v1445_v11 = vmul.f32 -1.442695, %v905_v3 }
 0xef1   :  { %1528 = vpow2.f32 %v1444_v61 }
 0xef2   :  { %v897_v57 = vpop.f32.mrf.mxu2 }
 0xef7   :  { %v1529_v62 = vpop.eup %1528 }
 0xef8   :  { %v912_v5 = vadd.f32 1.0, %v1529_v62 }
 0xefa   :  { %1530 = vrcp.f32 %v912_v5  ;;  %v925_v20 = vand.u32 2147483648, %v912_v5  ;;  %vm919_vm4 = vweird.f32 %v912_v5  ;;  %v923_v21 = vand.u32 2147483647, %v912_v5 }
 0xefb   :  { %1532 = vpow2.f32 %v1445_v11 }
 0xefc   :  { %v926_v23 = vor.u32 1.1754944e-38, %v925_v20  ;;  %vm924_vm6 = vcmp.eq.f32.partialorder %v923_v21, 8.507059e+37  ;;  %v1931_v20 = vld [vmem:[%s2046_s5] ss:$0 sm:$0xff] }
 0xf00   :  { %v1531_v8 = vpop.eup %1530 }
 0xf01   :  { %v915_v12 = vmul.f32 %v1531_v8, %v912_v5  ;;  %v1533_v15 = vpop.eup %1532  ;;  %vm920_vm3 = vweird.f32 %v1531_v8 }
 0xf02   :  { %v913_v18 = vadd.f32 1.0, %v1533_v15  ;;  %vm921_vm5 = vmor %vm919_vm4, %vm920_vm3 }
 0xf03   :  { %v916_v14 = vsub.f32 1.0, %v915_v12 }
 0xf04   :  { %1534 = vrcp.f32 %v913_v18  ;;  %v940_v63 = vand.u32 2147483648, %v913_v18  ;;  %vm934_vm8 = vweird.f32 %v913_v18  ;;  %v938_v1 = vand.u32 2147483647, %v913_v18 }
 0xf05   :  { %v917_v17 = vmul.f32 %v1531_v8, %v916_v14 }
 0xf06   :  { %v941_v36 = vor.u32 1.1754944e-38, %v940_v63  ;;  %vm939_vm12 = vcmp.eq.f32.partialorder %v938_v1, 8.507059e+37  ;;  %v1044_v63 = vld [vmem:[%s2041_s0 + $0x4] sm:$0x8] }
 0xf07   :  { %v918_v19 = vadd.f32 %v1531_v8, %v917_v17 }
 0xf09   :  { %v922_v22 = vsel %vm921_vm5, %v1531_v8, %v918_v19 }
 0xf0a   :  { %v927_v26 = vsel %vm924_vm6, %v926_v23, %v922_v22  ;;  %v1535_v29 = vpop.eup %1534 }
 0xf0b   :  { %v930_v30 = vmul.f32 %v1535_v29, %v913_v18  ;;  %vm935_vm7 = vweird.f32 %v1535_v29 }
 0xf0c   :  { %vm936_vm9 = vmor %vm934_vm8, %vm935_vm7 }
 0xf0d   :  { %v931_v31 = vsub.f32 1.0, %v930_v30 }
 0xf0f   :  { %v932_v32 = vmul.f32 %v1535_v29, %v931_v31 }
 0xf11   :  { %v933_v33 = vadd.f32 %v1535_v29, %v932_v32 }
 0xf13   :  { %v937_v35 = vsel %vm936_vm9, %v1535_v29, %v933_v33 }
 0xf14   :  { %v942_v39 = vsel %vm939_vm12, %v941_v36, %v937_v35  ;;  %v1046_v35 = vunpack.c.l.bf16 %v1044_v63 }
 0xf49   :  { %v949_v25 = vpop.permute.xlu2 %948 }
 0xf4a   :  { %v954_v27 = vmul.f32 %v949_v25, %v927_v26 }
 0xf4c   :  { %958 = vrot.lane.b32.xlu1 %v954_v27, %s1617_s9  ;;  %v1043_v27 = vld [vmem:[%s2041_s0] sm:$0x8] }
 0xf4d   :  { %v1045_v29 = vunpack.c.l.bf16 %v1043_v27 }
 0xf61   :  { %v951_v38 = vpop.permute.xlu0 %950 }
 0xf62   :  { %v955_v40 = vmul.f32 %v951_v38, %v942_v39 }
 0xf64   :  { %960 = vrot.lane.b32.xlu2 %v955_v40, %s1617_s9 }
 0xfbe   :  { %v961_v41 = vpop.permute.xlu2 %960  ;;  %v959_v42 = vpop.permute.xlu1 %958 }
 0xfbf   :  { %v965_v43 = vadd.f32 %v961_v41, %v885_v0  ;;  %v964_v44 = vadd.f32 %v959_v42, %v884_v58 }
 0xfc1   :  { %1536 = vtanh.f32 %v965_v43 }
 0xfc2   :  { %1538 = vtanh.f32 %v964_v44 }
 0xfc7   :  { %v1537_v45 = vpop.eup %1536 }
 0xfc8   :  { %v1539_v47 = vpop.eup %1538  ;;  %v971_v48 = vrot.slane %v1537_v45, 1 }
 0xfc9   :  { %v970_v50 = vrot.slane %v1539_v47, 1 }
 0xfca   :  { %v975_v51 = vsub.f32 %v1885_v37, %v971_v48 }
 0xfcb   :  { %v974_v52 = vsub.f32 %v1881_v34, %v970_v50 }
 0xfcc   :  { %v979_v53 = vrot.slane %v975_v51, 7 }
 0xfcd   :  { %v978_v54 = vrot.slane %v974_v52, 7 }
 0xfce   :  { %982 = vrot.lane.b32.xlu1 %v979_v53, %s1619_s21 }
 0xfcf   :  { %980 = vrot.lane.b32.xlu0 %v978_v54, %s1619_s21 }
0x1040   :  { %v983_v55 = vpop.permute.xlu1 %982 }
0x1041   :  { %v981_v56 = vpop.permute.xlu0 %980  ;;  %v987_v57 = vmul.f32 %v983_v55, %v942_v39 }
0x1042   :  { %v986_v16 = vmul.f32 %v981_v56, %v927_v26 }
0x1043   :  { %992 = vrot.lane.b32.xlu0 %v987_v57, %s1618_s11 }
0x1044   :  { %990 = vrot.lane.b32.xlu2 %v986_v16, %s1618_s11 }
0x109e   :  { %v991_v58 = vpop.permute.xlu2 %990 }
0x109f   :  { %v1913_v59 = vadd.f32 %v1539_v47, %v991_v58 }
0x10a1   :  { %v1009_v60 = vpack.c.bf16 %v1913_v59, %v1913_v59 }
0x10a3   :  { %v1013_v2 = vunpack.c.l.b16 %v1009_v60 }
0x10a5   :  { %v1015_v7 = vrot.slane %v1013_v2, 5 }
0x10b5   :  { %v993_v61 = vpop.permute.xlu0 %992 }
0x10b6   :  { %v1917_v62 = vadd.f32 %v1537_v45, %v993_v61 }
0x10b8   :  { %v1010_v5 = vpack.c.bf16 %v1917_v62, %v1917_v62 }
0x10ba   :  { %v1014_v0 = vunpack.c.l.b16 %v1010_v5 }
0x10bc   :  { %v1016_v3 = vrot.slane %v1014_v0, 4 }
0x10be   :  { %v1017_v8 = vsel %vm155_vm10, %v1016_v3, %v1015_v7 }
0x10bf   :  { %v1018_v11 = vpack.c.b16 %v1017_v8, %v1017_v8 }
0x10c1   :  { %1019 = vrot.lane.b32.xlu1 %v1018_v11, %s1617_s9 }
0x1133   :  { %v1020_v12 = vpop.permute.xlu1 %1019 }
0x1134   :  { %1446 = vmatmul.msk.bf16.vlgmr.msra.gmra.mxu3 %vm63_vm1, %v1020_v12  ;;  %1447 = vmatmul.msk.bf16.vlgmr.msrb.gmra.mxu0 %vm63_vm1, %v1020_v12 }
0x11b1   :  { %v1056_v14 = vpop.f32.mrf.mxu0 }
0x11b2   :  { %v1105_v15 = vadd.f32 %v1056_v14, %v1696_v6  ;;  %v1061_v30 = vrot.slane %v1056_v14, 2  ;;  %v1062_v36 = vrot.slane %v1056_v14, 3 }
0x11b4   :  { %v1108_v17 = vrot.slane %v1105_v15, 3  ;;  %v1107_v18 = vrot.slane %v1105_v15, 2  ;;  %v1065_v31 = vadd.f32 %v1061_v30, %v1045_v29  ;;  %v1066_v38 = vadd.f32 %v1062_v36, %v1046_v35 }
0x11b6   :  { %1111 = vrot.lane.b32.xlu0 %v1108_v17, %s1617_s9  ;;  %1109 = vrot.lane.b32.xlu2 %v1107_v18, %s1617_s9  ;;  %v1448_v32 = vmul.f32 -1.442695, %v1065_v31  ;;  %v1449_v40 = vmul.f32 -1.442695, %v1066_v38 }
0x11b7   :  { %v1033_v19 = vpop.f32.mrf.mxu3 }
0x11b8   :  { %v1034_v21 = vadd.f32 %v1931_v20, %v1033_v19  ;;  %1540 = vpow2.f32 %v1448_v32 }
0x11b9   :  { %v1058_v22 = vpop.f32.mrf.mxu0 }
0x11ba   :  { %v1037_v23 = vmax.f32 %v1034_v21, 0.0 }
0x11bc   :  { %v1039_v25 = vrot.slane %v1037_v23, 1  ;;  %1041 = vst.msk [vmem:[#allocation5 + $0x5] sm:$0x1] %vm238_vm11, %v1037_v23 }
0x11be   :  { %1042 = vst.msk [vmem:[#allocation5 + $0xd] sm:$0x1] %vm238_vm11, %v1039_v25  ;;  %v1541_v33 = vpop.eup %1540 }
0x11bf   :  { %v1035_v26 = vpop.f32.mrf.mxu3  ;;  %v1073_v1 = vadd.f32 1.0, %v1541_v33 }
0x11c1   :  { %1542 = vrcp.f32 %v1073_v1  ;;  %v1086_v48 = vand.u32 2147483648, %v1073_v1  ;;  %vm1080_vm14 = vweird.f32 %v1073_v1  ;;  %v1084_v50 = vand.u32 2147483647, %v1073_v1 }
0x11c2   :  { %1544 = vpow2.f32 %v1449_v40 }
0x11c3   :  { %v1087_v52 = vor.u32 1.1754944e-38, %v1086_v48  ;;  %vm1085_vm0 = vcmp.eq.f32.partialorder %v1084_v50, 8.507059e+37 }
0x11c7   :  { %v1543_v39 = vpop.eup %1542 }
0x11c8   :  { %v1076_v41 = vmul.f32 %v1543_v39, %v1073_v1  ;;  %v1545_v43 = vpop.eup %1544  ;;  %vm1081_vm13 = vweird.f32 %v1543_v39 }
0x11c9   :  { %v1074_v45 = vadd.f32 1.0, %v1545_v43  ;;  %vm1082_vm15 = vmor %vm1080_vm14, %vm1081_vm13 }
0x11ca   :  { %v1077_v42 = vsub.f32 1.0, %v1076_v41 }
0x11cb   :  { %1546 = vrcp.f32 %v1074_v45  ;;  %v1101_v61 = vand.u32 2147483648, %v1074_v45  ;;  %vm1095_vm3 = vweird.f32 %v1074_v45  ;;  %v1099_v2 = vand.u32 2147483647, %v1074_v45 }
0x11cc   :  { %v1078_v44 = vmul.f32 %v1543_v39, %v1077_v42 }
0x11cd   :  { %v1102_v0 = vor.u32 1.1754944e-38, %v1101_v61  ;;  %vm1100_vm5 = vcmp.eq.f32.partialorder %v1099_v2, 8.507059e+37 }
0x11ce   :  { %v1079_v47 = vadd.f32 %v1543_v39, %v1078_v44 }
0x11d0   :  { %v1083_v51 = vsel %vm1082_vm15, %v1543_v39, %v1079_v47 }
0x11d1   :  { %v1088_v54 = vsel %vm1085_vm0, %v1087_v52, %v1083_v51  ;;  %v1547_v56 = vpop.eup %1546  ;;  %vm189_vm0 = vcmask 253952  }
0x11d2   :  { %v1091_v57 = vmul.f32 %v1547_v56, %v1074_v45  ;;  %vm1096_vm2 = vweird.f32 %v1547_v56 }
0x11d3   :  { %vm1097_vm4 = vmor %vm1095_vm3, %vm1096_vm2  ;;  %vm363_vm2 = vcmask 254977   ;;  %vm684_vm3 = vcmask 257027  }
0x11d4   :  { %v1092_v16 = vsub.f32 1.0, %v1091_v57  ;;  %v1204_v57 = vld [vmem:[%s2041_s0] sm:$0x8] }
0x11d6   :  { %v1093_v58 = vmul.f32 %v1547_v56, %v1092_v16  ;;  %v1206_v16 = vunpack.c.l.bf16 %v1204_v57 }
0x11d8   :  { %v1094_v60 = vadd.f32 %v1547_v56, %v1093_v58 }
0x11da   :  { %v1098_v5 = vsel %vm1097_vm4, %v1547_v56, %v1094_v60  ;;  %vm845_vm4 = vcmask 258052  }
0x11db   :  { %v1103_v3 = vsel %vm1100_vm5, %v1102_v0, %v1098_v5  ;;  %vm523_vm5 = vcmask 256002  }
0x1210   :  { %v1110_v53 = vpop.permute.xlu2 %1109 }
0x1211   :  { %v1115_v55 = vmul.f32 %v1110_v53, %v1088_v54 }
0x1213   :  { %1119 = vrot.lane.b32.xlu1 %v1115_v55, %s1617_s9 }
0x1228   :  { %v1112_v7 = vpop.permute.xlu0 %1111 }
0x1229   :  { %v1116_v8 = vmul.f32 %v1112_v7, %v1103_v3 }
0x122b   :  { %1121 = vrot.lane.b32.xlu2 %v1116_v8, %s1617_s9 }
0x1285   :  { %v1122_v11 = vpop.permute.xlu2 %1121  ;;  %v1120_v12 = vpop.permute.xlu1 %1119 }
0x1286   :  { %v1126_v14 = vadd.f32 %v1122_v11, %v1046_v35  ;;  %v1125_v15 = vadd.f32 %v1120_v12, %v1045_v29 }
0x1288   :  { %1548 = vtanh.f32 %v1126_v14 }
0x1289   :  { %1550 = vtanh.f32 %v1125_v15 }
0x128e   :  { %v1549_v17 = vpop.eup %1548 }
0x128f   :  { %v1551_v18 = vpop.eup %1550  ;;  %v1132_v19 = vrot.slane %v1549_v17, 1 }
0x1290   :  { %v1131_v21 = vrot.slane %v1551_v18, 1 }
0x1291   :  { %v1136_v22 = vsub.f32 %v1917_v62, %v1132_v19 }
0x1292   :  { %v1135_v23 = vsub.f32 %v1913_v59, %v1131_v21 }
0x1293   :  { %v1140_v25 = vrot.slane %v1136_v22, 7 }
0x1294   :  { %v1139_v26 = vrot.slane %v1135_v23, 7 }
0x1295   :  { %1143 = vrot.lane.b32.xlu1 %v1140_v25, %s1619_s21 }
0x1296   :  { %1141 = vrot.lane.b32.xlu0 %v1139_v26, %s1619_s21 }
0x1307   :  { %v1144_v27 = vpop.permute.xlu1 %1143 }
0x1308   :  { %v1142_v30 = vpop.permute.xlu0 %1141  ;;  %v1148_v31 = vmul.f32 %v1144_v27, %v1103_v3 }
0x1309   :  { %v1147_v29 = vmul.f32 %v1142_v30, %v1088_v54 }
0x130a   :  { %1153 = vrot.lane.b32.xlu0 %v1148_v31, %s1618_s11 }
0x130b   :  { %1151 = vrot.lane.b32.xlu2 %v1147_v29, %s1618_s11 }
0x1365   :  { %v1152_v32 = vpop.permute.xlu2 %1151 }
0x1366   :  { %v1950_v33 = vadd.f32 %v1551_v18, %v1152_v32 }
0x1368   :  { %v1170_v63 = vpack.c.bf16 %v1950_v33, %v1950_v33 }
0x136a   :  { %v1174_v36 = vunpack.c.l.b16 %v1170_v63 }
0x136c   :  { %v1176_v40 = vrot.slane %v1174_v36, 6 }
0x137c   :  { %v1154_v1 = vpop.permute.xlu0 %1153 }
0x137d   :  { %v1954_v35 = vadd.f32 %v1549_v17, %v1154_v1 }
0x137f   :  { %v1171_v38 = vpack.c.bf16 %v1954_v35, %v1954_v35 }
0x1381   :  { %v1175_v39 = vunpack.c.l.b16 %v1171_v38 }
0x1383   :  { %v1177_v41 = vrot.slane %v1175_v39, 5 }
0x1385   :  { %v1178_v42 = vsel %vm155_vm10, %v1177_v41, %v1176_v40 }
0x1386   :  { %v1179_v43 = vpack.c.b16 %v1178_v42, %v1178_v42 }
0x1388   :  { %1180 = vrot.lane.b32.xlu1 %v1179_v43, %s1617_s9 }
0x13fa   :  { %v1181_v44 = vpop.permute.xlu1 %1180 }
0x13fb   :  { %1450 = vmatmul.msk.bf16.vlgmr.msrb.gmra.mxu1 %vm63_vm1, %v1181_v44  ;;  %1451 = vmatmul.msk.bf16.vlgmr.msrb.gmra.mxu2 %vm63_vm1, %v1181_v44 }
0x1478   :  { %v1194_v45 = vpop.f32.mrf.mxu1 }
0x1479   :  { %v1195_v47 = vadd.f32 %v1931_v20, %v1194_v45 }
0x147b   :  { %v1198_v48 = vmax.f32 %v1195_v47, 0.0 }
0x147d   :  { %v1200_v50 = vrot.slane %v1198_v48, 1  ;;  %1202 = vst.msk [vmem:[#allocation5 + $0x6] sm:$0x1] %vm238_vm11, %v1198_v48 }
0x147e   :  { %v1217_v51 = vpop.f32.mrf.mxu2 }
0x147f   :  { %1203 = vst.msk [vmem:[#allocation5 + $0xe] sm:$0x1] %vm238_vm11, %v1200_v50  ;;  %v1266_v52 = vadd.f32 %v1217_v51, %v1696_v6  ;;  %v1222_v58 = vrot.slane %v1217_v51, 1  ;;  %v1205_v6 = vld [vmem:[%s2041_s0 + $0x4] sm:$0x8]  ;;  %v1223_v7 = vrot.slane %v1217_v51, 2 }
0x1480   :  { %v1196_v53 = vpop.f32.mrf.mxu1  ;;  %v1207_v0 = vunpack.c.l.bf16 %v1205_v6  ;;  %s1620_s0 = smov [#allocation3]  }
0x1481   :  { %v1269_v54 = vrot.slane %v1266_v52, 2  ;;  %v1268_v55 = vrot.slane %v1266_v52, 1  ;;  %v1226_v60 = vadd.f32 %v1222_v58, %v1206_v16 }
0x1482   :  { %v1227_v3 = vadd.f32 %v1223_v7, %v1207_v0 }
0x1483   :  { %1272 = vrot.lane.b32.xlu0 %v1269_v54, %s1617_s9  ;;  %1270 = vrot.lane.b32.xlu2 %v1268_v55, %s1617_s9  ;;  %v1452_v61 = vmul.f32 -1.442695, %v1226_v60 }
0x1484   :  { %v1453_v11 = vmul.f32 -1.442695, %v1227_v3 }
0x1485   :  { %1552 = vpow2.f32 %v1452_v61 }
0x1486   :  { %v1219_v56 = vpop.f32.mrf.mxu2 }
0x148b   :  { %v1553_v2 = vpop.eup %1552 }
0x148c   :  { %v1234_v5 = vadd.f32 1.0, %v1553_v2 }
0x148e   :  { %1554 = vrcp.f32 %v1234_v5  ;;  %v1247_v21 = vand.u32 2147483648, %v1234_v5  ;;  %vm1241_vm7 = vweird.f32 %v1234_v5  ;;  %v1245_v22 = vand.u32 2147483647, %v1234_v5 }
0x148f   :  { %1556 = vpow2.f32 %v1453_v11 }
0x1490   :  { %v1248_v25 = vor.u32 1.1754944e-38, %v1247_v21  ;;  %vm1246_vm9 = vcmp.eq.f32.partialorder %v1245_v22, 8.507059e+37 }
0x1494   :  { %v1555_v8 = vpop.eup %1554 }
0x1495   :  { %v1237_v12 = vmul.f32 %v1555_v8, %v1234_v5  ;;  %v1557_v15 = vpop.eup %1556  ;;  %vm1242_vm6 = vweird.f32 %v1555_v8 }
0x1496   :  { %v1235_v18 = vadd.f32 1.0, %v1557_v15  ;;  %vm1243_vm8 = vmor %vm1241_vm7, %vm1242_vm6  ;;  %vm1167_vm6 = vcmask 260102   ;;  %vm1328_vm7 = vcmask 261127  }
0x1497   :  { %v1238_v14 = vsub.f32 1.0, %v1237_v12 }
0x1498   :  { %1558 = vrcp.f32 %v1235_v18  ;;  %v1262_v36 = vand.u32 2147483648, %v1235_v18  ;;  %vm1256_vm13 = vweird.f32 %v1235_v18  ;;  %v1260_v38 = vand.u32 2147483647, %v1235_v18 }
0x1499   :  { %v1239_v17 = vmul.f32 %v1555_v8, %v1238_v14 }
0x149a   :  { %v1263_v40 = vor.u32 1.1754944e-38, %v1262_v36  ;;  %vm1261_vm15 = vcmp.eq.f32.partialorder %v1260_v38, 8.507059e+37 }
0x149b   :  { %v1240_v19 = vadd.f32 %v1555_v8, %v1239_v17 }
0x149d   :  { %v1244_v23 = vsel %vm1243_vm8, %v1555_v8, %v1240_v19 }
0x149e   :  { %v1249_v27 = vsel %vm1246_vm9, %v1248_v25, %v1244_v23  ;;  %v1559_v31 = vpop.eup %1558 }
0x149f   :  { %v1252_v29 = vmul.f32 %v1559_v31, %v1235_v18  ;;  %vm1257_vm12 = vweird.f32 %v1559_v31 }
0x14a0   :  { %vm1258_vm14 = vmor %vm1256_vm13, %vm1257_vm12 }
0x14a1   :  { %v1253_v32 = vsub.f32 1.0, %v1252_v29 }
0x14a3   :  { %v1254_v63 = vmul.f32 %v1559_v31, %v1253_v32 }
0x14a5   :  { %v1255_v1 = vadd.f32 %v1559_v31, %v1254_v63 }
0x14a7   :  { %v1259_v39 = vsel %vm1258_vm14, %v1559_v31, %v1255_v1 }
0x14a8   :  { %v1264_v42 = vsel %vm1261_vm15, %v1263_v40, %v1259_v39 }
0x14dd   :  { %v1271_v26 = vpop.permute.xlu2 %1270 }
0x14de   :  { %v1276_v30 = vmul.f32 %v1271_v26, %v1249_v27 }
0x14e0   :  { %1280 = vrot.lane.b32.xlu1 %v1276_v30, %s1617_s9 }
0x14f5   :  { %v1273_v41 = vpop.permute.xlu0 %1272 }
0x14f6   :  { %v1277_v43 = vmul.f32 %v1273_v41, %v1264_v42 }
0x14f8   :  { %1282 = vrot.lane.b32.xlu2 %v1277_v43, %s1617_s9 }
0x1552   :  { %v1283_v44 = vpop.permute.xlu2 %1282  ;;  %v1281_v45 = vpop.permute.xlu1 %1280 }
0x1553   :  { %v1287_v47 = vadd.f32 %v1283_v44, %v1207_v0  ;;  %v1286_v48 = vadd.f32 %v1281_v45, %v1206_v16 }
0x1555   :  { %1560 = vtanh.f32 %v1287_v47 }
0x1556   :  { %1562 = vtanh.f32 %v1286_v48 }
0x155b   :  { %v1561_v50 = vpop.eup %1560 }
0x155c   :  { %v1563_v51 = vpop.eup %1562  ;;  %v1293_v52 = vrot.slane %v1561_v50, 1 }
0x155d   :  { %v1292_v53 = vrot.slane %v1563_v51, 1 }
0x155e   :  { %v1297_v54 = vsub.f32 %v1954_v35, %v1293_v52 }
0x155f   :  { %v1296_v55 = vsub.f32 %v1950_v33, %v1292_v53 }
0x1560   :  { %v1301_v56 = vrot.slane %v1297_v54, 7 }
0x1561   :  { %v1300_v57 = vrot.slane %v1296_v55, 7 }
0x1562   :  { %1304 = vrot.lane.b32.xlu1 %v1301_v56, %s1619_s21 }
0x1563   :  { %1302 = vrot.lane.b32.xlu0 %v1300_v57, %s1619_s21 }
0x15d4   :  { %v1305_v58 = vpop.permute.xlu1 %1304 }
0x15d5   :  { %v1303_v60 = vpop.permute.xlu0 %1302  ;;  %v1309_v61 = vmul.f32 %v1305_v58, %v1264_v42 }
0x15d6   :  { %v1308_v16 = vmul.f32 %v1303_v60, %v1249_v27 }
0x15d7   :  { %1314 = vrot.lane.b32.xlu0 %v1309_v61, %s1618_s11 }
0x15d8   :  { %1312 = vrot.lane.b32.xlu2 %v1308_v16, %s1618_s11 }
0x15df   :  { %185 = vrot.lane.b32.xlu0 %v1734_v4, %s1617_s9 }
0x15e0   :  { %183 = vrot.lane.b32.xlu2 %v1738_v9, %s1617_s9 }
0x15e7   :  { %517 = vrot.lane.b32.xlu0 %v1811_v46, %s1617_s9 }
0x15e8   :  { %359 = vrot.lane.b32.xlu2 %v1779_v28, %s1617_s9 }
0x15ef   :  { %680 = vrot.lane.b32.xlu0 %v1851_v13, %s1617_s9 }
0x15f0   :  { %678 = vrot.lane.b32.xlu2 %v1847_v10, %s1617_s9 }
0x15f7   :  { %1000 = vrot.lane.b32.xlu0 %v1913_v59, %s1617_s9 }
0x15f8   :  { %841 = vrot.lane.b32.xlu2 %v1885_v37, %s1617_s9 }
0x15ff   :  { %1163 = vrot.lane.b32.xlu0 %v1954_v35, %s1617_s9 }
0x1600   :  { %1161 = vrot.lane.b32.xlu2 %v1950_v33, %s1617_s9 }
0x1632   :  { %v1313_v4 = vpop.permute.xlu2 %1312 }
0x1633   :  { %v1318_v46 = vadd.f32 %v1563_v51, %v1313_v4 }
0x1635   :  { %v1331_v10 = vpack.c.bf16 %v1318_v46, %v1318_v46 }
0x1637   :  { %v1335_v35 = vunpack.c.l.b16 %v1331_v10 }
0x1639   :  { %v1337_v5 = vrot.slane %v1335_v35, 7 }
0x163a   :  { %v184_v9 = vpop.permute.xlu2 %183 }
0x163b   :  { %190 = vst.msk [vmem:[#allocation3] sm:$0x1] %vm189_vm0, %v184_v9 }
0x1642   :  { %v360_v28 = vpop.permute.xlu2 %359 }
0x1643   :  { %365 = vst.msk [vmem:[#allocation3 + $0x8] sm:$0x2] %vm363_vm2, %v360_v28 }
0x1649   :  { %v1315_v13 = vpop.permute.xlu0 %1314 }
0x164a   :  { %v679_v37 = vpop.permute.xlu2 %678  ;;  %v1319_v59 = vadd.f32 %v1561_v50, %v1315_v13 }
0x164b   :  { %685 = vst.msk [vmem:[#allocation3] sm:$0x8] %vm684_vm3, %v679_v37 }
0x164c   :  { %v1332_v2 = vpack.c.bf16 %v1319_v59, %v1319_v59  ;;  %1324 = vrot.lane.b32.xlu2 %v1319_v59, %s1617_s9  ;;  %v1365_v33 = vrot.slane %v1319_v59, 7 }
0x164e   :  { %v1336_v6 = vunpack.c.l.b16 %v1332_v2  ;;  %1366 = vrot.lane.b32.xlu0 %v1365_v33, %s1617_s9 }
0x1650   :  { %v1338_v0 = vrot.slane %v1336_v6, 6 }
0x1651   :  { %v186_v7 = vpop.permute.xlu0 %185 }
0x1652   :  { %v842_v3 = vpop.permute.xlu2 %841  ;;  %191 = vst.msk [vmem:[#allocation3 + $0x8] sm:$0x1] %vm189_vm0, %v186_v7  ;;  %v1339_v8 = vsel %vm155_vm10, %v1338_v0, %v1337_v5  ;;  %vm1006_vm10 = vcmask 259077  }
0x1653   :  { %847 = vst.msk [vmem:[#allocation3 + $0x8] sm:$0x10] %vm845_vm4, %v842_v3  ;;  %v1340_v11 = vpack.c.b16 %v1339_v8, %v1339_v8 }
0x1655   :  { %1341 = vrot.lane.b32.xlu1 %v1340_v11, %s1617_s9 }
0x1659   :  { %v518_v12 = vpop.permute.xlu0 %517 }
0x165a   :  { %v1162_v14 = vpop.permute.xlu2 %1161  ;;  %524 = vst.msk [vmem:[#allocation3] sm:$0x4] %vm523_vm5, %v518_v12 }
0x165b   :  { %1168 = vst.msk [vmem:[#allocation3] sm:$0x40] %vm1167_vm6, %v1162_v14 }
0x165d   :  { %357 = vrot.lane.b32.xlu1 %v1775_v24, %s1617_s9 }
0x1661   :  { %v681_v15 = vpop.permute.xlu0 %680 }
0x1662   :  { %686 = vst.msk [vmem:[#allocation3 + $0x8] sm:$0x8] %vm684_vm3, %v681_v15 }
0x1665   :  { %519 = vrot.lane.b32.xlu1 %v1815_v49, %s1617_s9 }
0x1669   :  { %v1001_v17 = vpop.permute.xlu0 %1000 }
0x166a   :  { %1007 = vst.msk [vmem:[#allocation3] sm:$0x20] %vm1006_vm10, %v1001_v17 }
0x166d   :  { %839 = vrot.lane.b32.xlu1 %v1881_v34, %s1617_s9 }
0x1671   :  { %v1164_v18 = vpop.permute.xlu0 %1163 }
0x1672   :  { %1169 = vst.msk [vmem:[#allocation3 + $0x8] sm:$0x40] %vm1167_vm6, %v1164_v18 }
0x1675   :  { %1002 = vrot.lane.b32.xlu1 %v1917_v62, %s1617_s9 }
0x167d   :  { %1322 = vrot.lane.b32.xlu1 %v1318_v46, %s1617_s9  ;;  %s1375_s9 = sshll.u32 %s1620_s0, 4  ;;  %s1376_s9 = int_to_ptr.vmem [resolvable:$true] %s1375_s9 }
0x16a6   :  { %v1325_v24 = vpop.permute.xlu2 %1324 }
0x16a7   :  { %1330 = vst.msk [vmem:[#allocation3 + $0x8] sm:$0x80] %vm1328_vm7, %v1325_v24 }
0x16c0   :  { %v1367_v19 = vpop.permute.xlu0 %1366 }
0x16c1   :  { %1370 = vst.msk [vmem:[#allocation2 + $0x1] sm:$0x1] %vm189_vm0, %v1367_v19 }
0x16c7   :  { %v1342_v49 = vpop.permute.xlu1 %1341 }
0x16c8   :  { %1454 = vmatmul.msk.bf16.vlgmr.msrb.gmra.mxu3 %vm63_vm1, %v1342_v49 }
0x16cf   :  { %v358_v21 = vpop.permute.xlu1 %357 }
0x16d0   :  { %364 = vst.msk [vmem:[#allocation3] sm:$0x2] %vm363_vm2, %v358_v21 }
0x16d7   :  { %v520_v34 = vpop.permute.xlu1 %519 }
0x16d8   :  { %525 = vst.msk [vmem:[#allocation3 + $0x8] sm:$0x4] %vm523_vm5, %v520_v34 }
0x16df   :  { %v840_v22 = vpop.permute.xlu1 %839 }
0x16e0   :  { %846 = vst.msk [vmem:[#allocation3] sm:$0x10] %vm845_vm4, %v840_v22 }
0x16e7   :  { %v1003_v62 = vpop.permute.xlu1 %1002 }
0x16e8   :  { %1008 = vst.msk [vmem:[#allocation3 + $0x8] sm:$0x20] %vm1006_vm10, %v1003_v62 }
0x16ef   :  { %v1323_v23 = vpop.permute.xlu1 %1322 }
0x16f0   :  { %1329 = vst.msk [vmem:[#allocation3] sm:$0x80] %vm1328_vm7, %v1323_v23 }
0x16f1   :  { %1369 = vst.msk [vmem:[#allocation2 - $0x7] sm:$0x80] %vm1328_vm7, %v1323_v23  ;;  %1383 = dma.vmem_to_hbm [thread:$0]  %s1376_s9, 256, %s1378_s23, [#allocation4], %s1621_s24, %s1621_s24, %s1622_s25  }
0x174b   :  { %v1355_v25 = vpop.f32.mrf.mxu3 }
0x174c   :  { %v1356_v26 = vadd.f32 %v1931_v20, %v1355_v25 }
0x174e   :  { %v1359_v27 = vmax.f32 %v1356_v26, 0.0 }
0x1750   :  { %v1361_v30 = vrot.slane %v1359_v27, 1  ;;  %1363 = vst.msk [vmem:[#allocation5 + $0x7] sm:$0x1] %vm238_vm11, %v1359_v27 }
0x1752   :  { %1364 = vst.msk [vmem:[#allocation5 + $0xf] sm:$0x1] %vm238_vm11, %v1361_v30 }
0x1753   :  { %v1357_v31 = vpop.f32.mrf.mxu3  ;;  %1396 = dma.vmem_to_hbm [thread:$0]  %s1389_s27, 256, %s1391_s30, [#allocation6], %s1621_s24, %s1621_s24, %s1622_s25  }
0x1754   :  { %1613 = dma.done.wait [#allocation4], 256  }
0x1755   :  { %1614 = vsyncadd [#allocation4], 4294967040 }
0x1756   :  { %1615 = dma.done.wait [#allocation6], 256  }
0x1757   :  { %1616 = vsyncadd [#allocation6], 4294967040 }
0x1758   :  { %1405 = vsyncpa [#allocation4], 1 }
0x1759   :  { %1406 = vsyncpa [#allocation6], 1 }

</bundles_post_ra>
